<compile_context>
chip_gen: v7x
topology: tpu7x:2x2x1
jax: 0.10.0
libtpu: 0.0.40
codegen_flags: <defaults>
</compile_context>

<pallas_src>
from functools import partial

import jax
import jax.numpy as jnp
from jax.experimental import pallas as pl
from jax.experimental.pallas import tpu as pltpu


# -----------------------------------------------------------------------------
# Fused kernel: 3x (ChebConv + ReLU) + global_max_pool + attention MLP head,
# executed per graph-tile (grid axis = graph tiles of GT graphs).
# -----------------------------------------------------------------------------
def fused_chebnet_kernel(lhat_ref, x_ref,
                         wc1_ref, bc1_ref, wc2_ref, bc2_ref, wc3_ref, bc3_ref,
                         wa1_ref, ba1_ref, wa2_ref, ba2_ref,
                         o_ref, *, K):
    GT, npg, _ = x_ref.shape
    lhat = lhat_ref[...]                        # (GT, npg, npg) bf16, VMEM resident
    h = x_ref[...].astype(jnp.float32)          # (GT, npg, Cin0) f32

    collapse_rows = (npg % 8 == 0)              # safe sublane-aligned row merge

    def cheb_layer(h, w_ref, b_ref):
        # Chebyshev recursion T_k = 2*L_hat@T_{k-1} - T_{k-2}, batched over the
        # GT graphs of this tile; f32 carries, bf16 MXU operands, f32 accum.
        ts = [h]
        if K > 1:
            t_prev = h
            t_cur = jnp.einsum('gij,gjc->gic', lhat, h.astype(jnp.bfloat16),
                               preferred_element_type=jnp.float32)
            ts.append(t_cur)
            for _ in range(2, K):
                t_next = 2.0 * jnp.einsum(
                    'gij,gjc->gic', lhat, t_cur.astype(jnp.bfloat16),
                    preferred_element_type=jnp.float32) - t_prev
                ts.append(t_next)
                t_prev, t_cur = t_cur, t_next
        # Concatenate T_0..T_{K-1} along channels -> one deep-contraction
        # feature matmul (K*Cin deep) instead of K shallow ones.
        t_cat = jnp.concatenate(ts, axis=-1).astype(jnp.bfloat16)  # (GT,npg,K*Cin)
        cout = w_ref.shape[-1]
        if collapse_rows:
            # Single MXU matmul over all GT*npg rows of the graph tile.
            z = jnp.dot(t_cat.reshape(GT * npg, -1), w_ref[...],
                        preferred_element_type=jnp.float32)
            z = jnp.maximum(z + b_ref[...], 0.0)                   # fused ReLU
            return z.reshape(GT, npg, cout)
        else:
            z = jnp.einsum('gnk,ko->gno', t_cat, w_ref[...],
                           preferred_element_type=jnp.float32)
            return jnp.maximum(z + b_ref[...], 0.0)

    h = cheb_layer(h, wc1_ref, bc1_ref)         # (GT, npg, 32)
    h = cheb_layer(h, wc2_ref, bc2_ref)         # (GT, npg, 64)
    h = cheb_layer(h, wc3_ref, bc3_ref)         # (GT, npg, 64)

    # Epilogue: global_max_pool per graph + attention MLP head for the whole
    # graph tile in one pair of matmuls.
    pooled = jnp.max(h, axis=1)                               # (GT, 64)
    z = jnp.dot(pooled, wa1_ref[...], preferred_element_type=jnp.float32)
    z = jnp.maximum(z + ba1_ref[...], 0.0)                    # relu(attention1)
    out = jnp.dot(z, wa2_ref[...],
                  preferred_element_type=jnp.float32) + ba2_ref[...]
    o_ref[...] = out                                          # (GT, ys)


def chebnet_structural_forward(x, lhat_blocks, params, num_graphs,
                               nodes_per_graph, graphs_per_tile=None):
    """x: (N, x_s) node features; lhat_blocks: (B, npg, npg) bf16; -> (B, ys)."""
    B, npg = num_graphs, nodes_per_graph
    xb = x.reshape(B, npg, -1).astype(jnp.float32)
    x_s = xb.shape[-1]
    K = params["w_c1"].shape[0]
    ys = params["w_a2"].shape[1]

    # Graphs per grid step: amortizes pipeline overhead, keeps out-spec legal
    # (GT == Bp when B <= 8, else GT = 8 which is sublane aligned).
    GT = graphs_per_tile if graphs_per_tile is not None else min(B, 8)
    Bp = ((B + GT - 1) // GT) * GT
    if Bp != B:
        pad = Bp - B
        eye = jnp.broadcast_to(jnp.eye(npg, dtype=lhat_blocks.dtype),
                               (pad, npg, npg))
        lhat_blocks = jnp.concatenate([lhat_blocks, eye], axis=0)
        xb = jnp.concatenate([xb, jnp.zeros((pad, npg, x_s), xb.dtype)], axis=0)

    def wcat(w):   # (K, Cin, Cout) -> (K*Cin, Cout) bf16; rows k-major, matches concat([T_0..T_{K-1}])
        Kk, Cin, Cout = w.shape
        return w.reshape(Kk * Cin, Cout).astype(jnp.bfloat16)

    def brow(b):
        return b.reshape(1, -1).astype(jnp.float32)

    wc1, wc2, wc3 = wcat(params["w_c1"]), wcat(params["w_c2"]), wcat(params["w_c3"])
    bc1, bc2, bc3 = brow(params["b_c1"]), brow(params["b_c2"]), brow(params["b_c3"])
    wa1 = params["w_a1"].astype(jnp.float32)
    ba1 = brow(params["b_a1"])
    wa2 = params["w_a2"].astype(jnp.float32)
    ba2 = brow(params["b_a2"])

    def resident(arr):   # whole-array block, constant index_map -> fetched once
        return pl.BlockSpec(arr.shape, lambda g, n=arr.ndim: (0,) * n)

    grid_spec = pltpu.PrefetchScalarGridSpec(
        num_scalar_prefetch=0,
        grid=(Bp // GT,),
        in_specs=[
            pl.BlockSpec((GT, npg, npg), lambda g: (g, 0, 0)),   # per-tile L_hat blocks
            pl.BlockSpec((GT, npg, x_s), lambda g: (g, 0, 0)),   # per-tile node feats
            resident(wc1), resident(bc1), resident(wc2), resident(bc2),
            resident(wc3), resident(bc3),
            resident(wa1), resident(ba1), resident(wa2), resident(ba2),
        ],
        out_specs=pl.BlockSpec((GT, ys), lambda g: (g, 0)),
    )

    out = pl.pallas_call(
        partial(fused_chebnet_kernel, K=K),
        grid_spec=grid_spec,
        out_shape=jax.ShapeDtypeStruct((Bp, ys), jnp.float32),
        compiler_params=pltpu.CompilerParams(
            dimension_semantics=("parallel",),          # graph tiles independent -> megacore (v7x)
            vmem_limit_bytes=64 * 1024 * 1024,
        ),
    )(lhat_blocks, xb, wc1, bc1, wc2, bc2, wc3, bc3, wa1, ba1, wa2, ba2)
    return out[:B]


# -----------------------------------------------------------------------------
# Glue: per-graph scaled Laplacian blocks (PyG ChebConv sym normalization):
#   L_hat_g = 2*(I - D^-1/2 A D^-1/2)/lambda_max_g - I
# Graphs are assumed equal-size and packed contiguously (block-diagonal batch).
# -----------------------------------------------------------------------------
def build_scaled_laplacian_blocks(edge_index, num_graphs, nodes_per_graph,
                                  lambda_max):
    N = num_graphs * nodes_per_graph
    src, dst = edge_index
    A = jnp.zeros((N, N), jnp.float32).at[src, dst].set(1.0)
    deg = A.sum(axis=1)
    d_inv_sqrt = jnp.where(deg > 0, jax.lax.rsqrt(deg), 0.0)
    A_norm = d_inv_sqrt[:, None] * A * d_inv_sqrt[None, :]
    L = jnp.eye(N, dtype=jnp.float32) - A_norm
    # extract per-graph diagonal blocks (block-diagonal batched graph)
    L4 = L.reshape(num_graphs, nodes_per_graph, num_graphs, nodes_per_graph)
    blocks = jnp.stack([L4[g, :, g, :] for g in range(num_graphs)], axis=0)
    lam = jnp.asarray(lambda_max, jnp.float32).reshape(-1)
    if lam.size == 1:
        lam = jnp.full((num_graphs,), lam[0], jnp.float32)
    lhat = (2.0 / lam)[:, None, None] * blocks \
        - jnp.eye(nodes_per_graph, dtype=jnp.float32)[None]
    return lhat.astype(jnp.bfloat16)


def ring_graph_edges(num_graphs, nodes_per_graph):
    """Disjoint undirected ring graphs (block-diagonal batch), like PyG batching."""
    srcs, dsts = [], []
    for g in range(num_graphs):
        off = g * nodes_per_graph
        for i in range(nodes_per_graph):
            j = (i + 1) % nodes_per_graph
            srcs += [off + i, off + j]
            dsts += [off + j, off + i]
    return jnp.array(srcs, jnp.int32), jnp.array(dsts, jnp.int32)


def init_params(key, x_s=4, S=5, ys=1, neuron=64):
    ks = jax.random.split(key, 10)

    def lin(k, cin, cout):
        return 0.1 * jax.random.normal(k, (cin, cout), jnp.float32)

    return {
        # ChebConv weights: (K, in, out); biases: (out,)
        "w_c1": 0.1 * jax.random.normal(ks[0], (S, x_s, 32), jnp.float32),
        "b_c1": 0.01 * jax.random.normal(ks[1], (32,), jnp.float32),
        "w_c2": 0.1 * jax.random.normal(ks[2], (S, 32, 64), jnp.float32),
        "b_c2": 0.01 * jax.random.normal(ks[3], (64,), jnp.float32),
        "w_c3": 0.1 * jax.random.normal(ks[4], (S, 64, 64), jnp.float32),
        "b_c3": 0.01 * jax.random.normal(ks[5], (64,), jnp.float32),
        # attention1: Linear(64 -> 16), attention2: Linear(16 -> ys)
        "w_a1": lin(ks[6], neuron, 16),
        "b_a1": 0.01 * jax.random.normal(ks[7], (16,), jnp.float32),
        "w_a2": lin(ks[8], 16, ys),
        "b_a2": 0.01 * jax.random.normal(ks[9], (ys,), jnp.float32),
    }


if __name__ == "__main__":
    # Small deterministic problem: 2 graphs x 8 nodes, 4 input node features.
    num_graphs = 2
    nodes_per_graph = 8
    num_nodes = num_graphs * nodes_per_graph
    x_s, S, ys = 4, 5, 1

    key = jax.random.PRNGKey(0)
    k_x, k_p = jax.random.split(key)

    x = jax.random.normal(k_x, (num_nodes, x_s), jnp.float32)      # data.x
    edge_index = ring_graph_edges(num_graphs, nodes_per_graph)     # data.edge_index
    lambda_max = jnp.full((num_graphs,), 2.0, jnp.float32)         # data.lmax (per graph)
    lhat_blocks = build_scaled_laplacian_blocks(edge_index, num_graphs,
                                                nodes_per_graph, lambda_max)

    params = init_params(k_p, x_s=x_s, S=S, ys=ys)

    out = chebnet_structural_forward(x, lhat_blocks, params,
                                     num_graphs, nodes_per_graph)
    jax.block_until_ready(out)
    assert out.shape == (num_graphs, ys)
    print("KERNEL_OK")
</pallas_src>

<mosaic_0001>
module attributes {stable_mosaic.version = 11 : i64} {
  func.func @fused_chebnet_kernel(%arg0: i32, %arg1: memref<2x8x8xbf16, #tpu.memory_space<vmem>>, %arg2: memref<2x8x4xf32, #tpu.memory_space<vmem>>, %arg3: memref<20x32xbf16, #tpu.memory_space<vmem>>, %arg4: memref<1x32xf32, #tpu.memory_space<vmem>>, %arg5: memref<160x64xbf16, #tpu.memory_space<vmem>>, %arg6: memref<1x64xf32, #tpu.memory_space<vmem>>, %arg7: memref<320x64xbf16, #tpu.memory_space<vmem>>, %arg8: memref<1x64xf32, #tpu.memory_space<vmem>>, %arg9: memref<64x16xf32, #tpu.memory_space<vmem>>, %arg10: memref<1x16xf32, #tpu.memory_space<vmem>>, %arg11: memref<16x1xf32, #tpu.memory_space<vmem>>, %arg12: memref<1x1xf32, #tpu.memory_space<vmem>>, %arg13: memref<2x1xf32, #tpu.memory_space<vmem>>) attributes {dimension_semantics = [#tpu.dimension_semantics<parallel>], iteration_bounds = array<i64: 1>, scalar_prefetch = 0 : i64, scratch_operands = 0 : i64, tpu.core_type = #tpu.core_type<tc>, window_params = [{transform_indices = @transform_0, window_bounds = array<i64: 2, 8, 8>}, {transform_indices = @transform_1, window_bounds = array<i64: 2, 8, 4>}, {pipeline_mode = #tpu.pipeline_mode<synchronous>, transform_indices = @transform_2, window_bounds = array<i64: 20, 32>}, {pipeline_mode = #tpu.pipeline_mode<synchronous>, transform_indices = @transform_3, window_bounds = array<i64: 1, 32>}, {pipeline_mode = #tpu.pipeline_mode<synchronous>, transform_indices = @transform_4, window_bounds = array<i64: 160, 64>}, {pipeline_mode = #tpu.pipeline_mode<synchronous>, transform_indices = @transform_5, window_bounds = array<i64: 1, 64>}, {pipeline_mode = #tpu.pipeline_mode<synchronous>, transform_indices = @transform_6, window_bounds = array<i64: 320, 64>}, {pipeline_mode = #tpu.pipeline_mode<synchronous>, transform_indices = @transform_7, window_bounds = array<i64: 1, 64>}, {pipeline_mode = #tpu.pipeline_mode<synchronous>, transform_indices = @transform_8, window_bounds = array<i64: 64, 16>}, {pipeline_mode = #tpu.pipeline_mode<synchronous>, transform_indices = @transform_9, window_bounds = array<i64: 1, 16>}, {pipeline_mode = #tpu.pipeline_mode<synchronous>, transform_indices = @transform_10, window_bounds = array<i64: 16, 1>}, {pipeline_mode = #tpu.pipeline_mode<synchronous>, transform_indices = @transform_11, window_bounds = array<i64: 1, 1>}, {transform_indices = @transform_12, window_bounds = array<i64: 2, 1>}]} {
    %c0 = arith.constant 0 : index
    %c0_0 = arith.constant 0 : index
    %c0_1 = arith.constant 0 : index
    %0 = vector.load %arg1[%c0, %c0_0, %c0_1] : memref<2x8x8xbf16, #tpu.memory_space<vmem>>, vector<2x8x8xbf16>
    %c0_2 = arith.constant 0 : index
    %c0_3 = arith.constant 0 : index
    %c0_4 = arith.constant 0 : index
    %1 = vector.load %arg2[%c0_2, %c0_3, %c0_4] : memref<2x8x4xf32, #tpu.memory_space<vmem>>, vector<2x8x4xf32>
    %2 = arith.truncf %1 : vector<2x8x4xf32> to vector<2x8x4xbf16>
    "tpu.trace_start"() <{level = 10 : i32, message = "gij,gjc->gic"}> : () -> ()
    %cst = arith.constant dense<0.000000e+00> : vector<2x8x4xf32>
    %3 = tpu.matmul %0, %2, %cst {dimension_numbers = #tpu.dot_dimension_numbers<[2], [1], [1], [2], [0, 0, 0, 1, 1, 2], [0], [0]>} : vector<2x8x8xbf16>, vector<2x8x4xbf16>, vector<2x8x4xf32> -> vector<2x8x4xf32>
    "tpu.trace_stop"() : () -> ()
    %4 = arith.truncf %3 : vector<2x8x4xf32> to vector<2x8x4xbf16>
    "tpu.trace_start"() <{level = 10 : i32, message = "gij,gjc->gic"}> : () -> ()
    %cst_5 = arith.constant dense<0.000000e+00> : vector<2x8x4xf32>
    %5 = tpu.matmul %0, %4, %cst_5 {dimension_numbers = #tpu.dot_dimension_numbers<[2], [1], [1], [2], [0, 0, 0, 1, 1, 2], [0], [0]>} : vector<2x8x8xbf16>, vector<2x8x4xbf16>, vector<2x8x4xf32> -> vector<2x8x4xf32>
    "tpu.trace_stop"() : () -> ()
    %cst_6 = arith.constant 2.000000e+00 : f32
    %6 = vector.broadcast %cst_6 : f32 to vector<2x8x4xf32>
    %7 = arith.mulf %6, %5 : vector<2x8x4xf32>
    %8 = arith.subf %7, %1 : vector<2x8x4xf32>
    %9 = arith.truncf %8 : vector<2x8x4xf32> to vector<2x8x4xbf16>
    "tpu.trace_start"() <{level = 10 : i32, message = "gij,gjc->gic"}> : () -> ()
    %cst_7 = arith.constant dense<0.000000e+00> : vector<2x8x4xf32>
    %10 = tpu.matmul %0, %9, %cst_7 {dimension_numbers = #tpu.dot_dimension_numbers<[2], [1], [1], [2], [0, 0, 0, 1, 1, 2], [0], [0]>} : vector<2x8x8xbf16>, vector<2x8x4xbf16>, vector<2x8x4xf32> -> vector<2x8x4xf32>
    "tpu.trace_stop"() : () -> ()
    %cst_8 = arith.constant 2.000000e+00 : f32
    %11 = vector.broadcast %cst_8 : f32 to vector<2x8x4xf32>
    %12 = arith.mulf %11, %10 : vector<2x8x4xf32>
    %13 = arith.subf %12, %3 : vector<2x8x4xf32>
    %14 = arith.truncf %13 : vector<2x8x4xf32> to vector<2x8x4xbf16>
    "tpu.trace_start"() <{level = 10 : i32, message = "gij,gjc->gic"}> : () -> ()
    %cst_9 = arith.constant dense<0.000000e+00> : vector<2x8x4xf32>
    %15 = tpu.matmul %0, %14, %cst_9 {dimension_numbers = #tpu.dot_dimension_numbers<[2], [1], [1], [2], [0, 0, 0, 1, 1, 2], [0], [0]>} : vector<2x8x8xbf16>, vector<2x8x4xbf16>, vector<2x8x4xf32> -> vector<2x8x4xf32>
    "tpu.trace_stop"() : () -> ()
    %cst_10 = arith.constant 2.000000e+00 : f32
    %16 = vector.broadcast %cst_10 : f32 to vector<2x8x4xf32>
    %17 = arith.mulf %16, %15 : vector<2x8x4xf32>
    %18 = arith.subf %17, %8 : vector<2x8x4xf32>
    %19 = tpu.concatenate %1, %3, %8, %13, %18 in 2 : vector<2x8x4xf32>, vector<2x8x4xf32>, vector<2x8x4xf32>, vector<2x8x4xf32>, vector<2x8x4xf32> -> vector<2x8x20xf32>
    %20 = arith.truncf %19 : vector<2x8x20xf32> to vector<2x8x20xbf16>
    %21 = vector.shape_cast %20 : vector<2x8x20xbf16> to vector<16x20xbf16>
    %c0_11 = arith.constant 0 : index
    %c0_12 = arith.constant 0 : index
    %22 = vector.load %arg3[%c0_11, %c0_12] : memref<20x32xbf16, #tpu.memory_space<vmem>>, vector<20x32xbf16>
    %cst_13 = arith.constant dense<0.000000e+00> : vector<16x32xf32>
    %23 = tpu.matmul %21, %22, %cst_13 {dimension_numbers = #tpu.dot_dimension_numbers<[1], [0], [0], [1], [0, 0, 1, 1], [], []>} : vector<16x20xbf16>, vector<20x32xbf16>, vector<16x32xf32> -> vector<16x32xf32>
    %c0_14 = arith.constant 0 : index
    %c0_15 = arith.constant 0 : index
    %24 = vector.load %arg4[%c0_14, %c0_15] : memref<1x32xf32, #tpu.memory_space<vmem>>, vector<1x32xf32>
    %25 = vector.broadcast %24 : vector<1x32xf32> to vector<16x32xf32>
    %26 = arith.addf %23, %25 : vector<16x32xf32>
    %cst_16 = arith.constant 0.000000e+00 : f32
    %27 = vector.broadcast %cst_16 : f32 to vector<16x32xf32>
    %28 = arith.maximumf %26, %27 : vector<16x32xf32>
    %29 = vector.shape_cast %28 : vector<16x32xf32> to vector<2x8x32xf32>
    %30 = arith.truncf %29 : vector<2x8x32xf32> to vector<2x8x32xbf16>
    "tpu.trace_start"() <{level = 10 : i32, message = "gij,gjc->gic"}> : () -> ()
    %cst_17 = arith.constant dense<0.000000e+00> : vector<2x8x32xf32>
    %31 = tpu.matmul %0, %30, %cst_17 {dimension_numbers = #tpu.dot_dimension_numbers<[2], [1], [1], [2], [0, 0, 0, 1, 1, 2], [0], [0]>} : vector<2x8x8xbf16>, vector<2x8x32xbf16>, vector<2x8x32xf32> -> vector<2x8x32xf32>
    "tpu.trace_stop"() : () -> ()
    %32 = arith.truncf %31 : vector<2x8x32xf32> to vector<2x8x32xbf16>
    "tpu.trace_start"() <{level = 10 : i32, message = "gij,gjc->gic"}> : () -> ()
    %cst_18 = arith.constant dense<0.000000e+00> : vector<2x8x32xf32>
    %33 = tpu.matmul %0, %32, %cst_18 {dimension_numbers = #tpu.dot_dimension_numbers<[2], [1], [1], [2], [0, 0, 0, 1, 1, 2], [0], [0]>} : vector<2x8x8xbf16>, vector<2x8x32xbf16>, vector<2x8x32xf32> -> vector<2x8x32xf32>
    "tpu.trace_stop"() : () -> ()
    %cst_19 = arith.constant 2.000000e+00 : f32
    %34 = vector.broadcast %cst_19 : f32 to vector<2x8x32xf32>
    %35 = arith.mulf %34, %33 : vector<2x8x32xf32>
    %36 = arith.subf %35, %29 : vector<2x8x32xf32>
    %37 = arith.truncf %36 : vector<2x8x32xf32> to vector<2x8x32xbf16>
    "tpu.trace_start"() <{level = 10 : i32, message = "gij,gjc->gic"}> : () -> ()
    %cst_20 = arith.constant dense<0.000000e+00> : vector<2x8x32xf32>
    %38 = tpu.matmul %0, %37, %cst_20 {dimension_numbers = #tpu.dot_dimension_numbers<[2], [1], [1], [2], [0, 0, 0, 1, 1, 2], [0], [0]>} : vector<2x8x8xbf16>, vector<2x8x32xbf16>, vector<2x8x32xf32> -> vector<2x8x32xf32>
    "tpu.trace_stop"() : () -> ()
    %cst_21 = arith.constant 2.000000e+00 : f32
    %39 = vector.broadcast %cst_21 : f32 to vector<2x8x32xf32>
    %40 = arith.mulf %39, %38 : vector<2x8x32xf32>
    %41 = arith.subf %40, %31 : vector<2x8x32xf32>
    %42 = arith.truncf %41 : vector<2x8x32xf32> to vector<2x8x32xbf16>
    "tpu.trace_start"() <{level = 10 : i32, message = "gij,gjc->gic"}> : () -> ()
    %cst_22 = arith.constant dense<0.000000e+00> : vector<2x8x32xf32>
    %43 = tpu.matmul %0, %42, %cst_22 {dimension_numbers = #tpu.dot_dimension_numbers<[2], [1], [1], [2], [0, 0, 0, 1, 1, 2], [0], [0]>} : vector<2x8x8xbf16>, vector<2x8x32xbf16>, vector<2x8x32xf32> -> vector<2x8x32xf32>
    "tpu.trace_stop"() : () -> ()
    %cst_23 = arith.constant 2.000000e+00 : f32
    %44 = vector.broadcast %cst_23 : f32 to vector<2x8x32xf32>
    %45 = arith.mulf %44, %43 : vector<2x8x32xf32>
    %46 = arith.subf %45, %36 : vector<2x8x32xf32>
    %47 = tpu.concatenate %29, %31, %36, %41, %46 in 2 : vector<2x8x32xf32>, vector<2x8x32xf32>, vector<2x8x32xf32>, vector<2x8x32xf32>, vector<2x8x32xf32> -> vector<2x8x160xf32>
    %48 = arith.truncf %47 : vector<2x8x160xf32> to vector<2x8x160xbf16>
    %49 = vector.shape_cast %48 : vector<2x8x160xbf16> to vector<16x160xbf16>
    %c0_24 = arith.constant 0 : index
    %c0_25 = arith.constant 0 : index
    %50 = vector.load %arg5[%c0_24, %c0_25] : memref<160x64xbf16, #tpu.memory_space<vmem>>, vector<160x64xbf16>
    %cst_26 = arith.constant dense<0.000000e+00> : vector<16x64xf32>
    %51 = tpu.matmul %49, %50, %cst_26 {dimension_numbers = #tpu.dot_dimension_numbers<[1], [0], [0], [1], [0, 0, 1, 1], [], []>} : vector<16x160xbf16>, vector<160x64xbf16>, vector<16x64xf32> -> vector<16x64xf32>
    %c0_27 = arith.constant 0 : index
    %c0_28 = arith.constant 0 : index
    %52 = vector.load %arg6[%c0_27, %c0_28] : memref<1x64xf32, #tpu.memory_space<vmem>>, vector<1x64xf32>
    %53 = vector.broadcast %52 : vector<1x64xf32> to vector<16x64xf32>
    %54 = arith.addf %51, %53 : vector<16x64xf32>
    %cst_29 = arith.constant 0.000000e+00 : f32
    %55 = vector.broadcast %cst_29 : f32 to vector<16x64xf32>
    %56 = arith.maximumf %54, %55 : vector<16x64xf32>
    %57 = vector.shape_cast %56 : vector<16x64xf32> to vector<2x8x64xf32>
    %58 = arith.truncf %57 : vector<2x8x64xf32> to vector<2x8x64xbf16>
    "tpu.trace_start"() <{level = 10 : i32, message = "gij,gjc->gic"}> : () -> ()
    %cst_30 = arith.constant dense<0.000000e+00> : vector<2x8x64xf32>
    %59 = tpu.matmul %0, %58, %cst_30 {dimension_numbers = #tpu.dot_dimension_numbers<[2], [1], [1], [2], [0, 0, 0, 1, 1, 2], [0], [0]>} : vector<2x8x8xbf16>, vector<2x8x64xbf16>, vector<2x8x64xf32> -> vector<2x8x64xf32>
    "tpu.trace_stop"() : () -> ()
    %60 = arith.truncf %59 : vector<2x8x64xf32> to vector<2x8x64xbf16>
    "tpu.trace_start"() <{level = 10 : i32, message = "gij,gjc->gic"}> : () -> ()
    %cst_31 = arith.constant dense<0.000000e+00> : vector<2x8x64xf32>
    %61 = tpu.matmul %0, %60, %cst_31 {dimension_numbers = #tpu.dot_dimension_numbers<[2], [1], [1], [2], [0, 0, 0, 1, 1, 2], [0], [0]>} : vector<2x8x8xbf16>, vector<2x8x64xbf16>, vector<2x8x64xf32> -> vector<2x8x64xf32>
    "tpu.trace_stop"() : () -> ()
    %cst_32 = arith.constant 2.000000e+00 : f32
    %62 = vector.broadcast %cst_32 : f32 to vector<2x8x64xf32>
    %63 = arith.mulf %62, %61 : vector<2x8x64xf32>
    %64 = arith.subf %63, %57 : vector<2x8x64xf32>
    %65 = arith.truncf %64 : vector<2x8x64xf32> to vector<2x8x64xbf16>
    "tpu.trace_start"() <{level = 10 : i32, message = "gij,gjc->gic"}> : () -> ()
    %cst_33 = arith.constant dense<0.000000e+00> : vector<2x8x64xf32>
    %66 = tpu.matmul %0, %65, %cst_33 {dimension_numbers = #tpu.dot_dimension_numbers<[2], [1], [1], [2], [0, 0, 0, 1, 1, 2], [0], [0]>} : vector<2x8x8xbf16>, vector<2x8x64xbf16>, vector<2x8x64xf32> -> vector<2x8x64xf32>
    "tpu.trace_stop"() : () -> ()
    %cst_34 = arith.constant 2.000000e+00 : f32
    %67 = vector.broadcast %cst_34 : f32 to vector<2x8x64xf32>
    %68 = arith.mulf %67, %66 : vector<2x8x64xf32>
    %69 = arith.subf %68, %59 : vector<2x8x64xf32>
    %70 = arith.truncf %69 : vector<2x8x64xf32> to vector<2x8x64xbf16>
    "tpu.trace_start"() <{level = 10 : i32, message = "gij,gjc->gic"}> : () -> ()
    %cst_35 = arith.constant dense<0.000000e+00> : vector<2x8x64xf32>
    %71 = tpu.matmul %0, %70, %cst_35 {dimension_numbers = #tpu.dot_dimension_numbers<[2], [1], [1], [2], [0, 0, 0, 1, 1, 2], [0], [0]>} : vector<2x8x8xbf16>, vector<2x8x64xbf16>, vector<2x8x64xf32> -> vector<2x8x64xf32>
    "tpu.trace_stop"() : () -> ()
    %cst_36 = arith.constant 2.000000e+00 : f32
    %72 = vector.broadcast %cst_36 : f32 to vector<2x8x64xf32>
    %73 = arith.mulf %72, %71 : vector<2x8x64xf32>
    %74 = arith.subf %73, %64 : vector<2x8x64xf32>
    %75 = tpu.concatenate %57, %59, %64, %69, %74 in 2 : vector<2x8x64xf32>, vector<2x8x64xf32>, vector<2x8x64xf32>, vector<2x8x64xf32>, vector<2x8x64xf32> -> vector<2x8x320xf32>
    %76 = arith.truncf %75 : vector<2x8x320xf32> to vector<2x8x320xbf16>
    %77 = vector.shape_cast %76 : vector<2x8x320xbf16> to vector<16x320xbf16>
    %c0_37 = arith.constant 0 : index
    %c0_38 = arith.constant 0 : index
    %78 = vector.load %arg7[%c0_37, %c0_38] : memref<320x64xbf16, #tpu.memory_space<vmem>>, vector<320x64xbf16>
    %cst_39 = arith.constant dense<0.000000e+00> : vector<16x64xf32>
    %79 = tpu.matmul %77, %78, %cst_39 {dimension_numbers = #tpu.dot_dimension_numbers<[1], [0], [0], [1], [0, 0, 1, 1], [], []>} : vector<16x320xbf16>, vector<320x64xbf16>, vector<16x64xf32> -> vector<16x64xf32>
    %c0_40 = arith.constant 0 : index
    %c0_41 = arith.constant 0 : index
    %80 = vector.load %arg8[%c0_40, %c0_41] : memref<1x64xf32, #tpu.memory_space<vmem>>, vector<1x64xf32>
    %81 = vector.broadcast %80 : vector<1x64xf32> to vector<16x64xf32>
    %82 = arith.addf %79, %81 : vector<16x64xf32>
    %cst_42 = arith.constant 0.000000e+00 : f32
    %83 = vector.broadcast %cst_42 : f32 to vector<16x64xf32>
    %84 = arith.maximumf %82, %83 : vector<16x64xf32>
    %85 = vector.shape_cast %84 : vector<16x64xf32> to vector<2x8x64xf32>
    %cst_43 = arith.constant dense<0xFF800000> : vector<2x64xf32>
    %86 = vector.multi_reduction <maximumf>, %85, %cst_43 [1] : vector<2x8x64xf32> to vector<2x64xf32>
    %c0_44 = arith.constant 0 : index
    %c0_45 = arith.constant 0 : index
    %87 = vector.load %arg9[%c0_44, %c0_45] : memref<64x16xf32, #tpu.memory_space<vmem>>, vector<64x16xf32>
    %cst_46 = arith.constant dense<0.000000e+00> : vector<2x16xf32>
    %88 = tpu.matmul %86, %87, %cst_46 {dimension_numbers = #tpu.dot_dimension_numbers<[1], [0], [0], [1], [0, 0, 1, 1], [], []>} : vector<2x64xf32>, vector<64x16xf32>, vector<2x16xf32> -> vector<2x16xf32>
    %c0_47 = arith.constant 0 : index
    %c0_48 = arith.constant 0 : index
    %89 = vector.load %arg10[%c0_47, %c0_48] : memref<1x16xf32, #tpu.memory_space<vmem>>, vector<1x16xf32>
    %90 = vector.broadcast %89 : vector<1x16xf32> to vector<2x16xf32>
    %91 = arith.addf %88, %90 : vector<2x16xf32>
    %cst_49 = arith.constant 0.000000e+00 : f32
    %92 = vector.broadcast %cst_49 : f32 to vector<2x16xf32>
    %93 = arith.maximumf %91, %92 : vector<2x16xf32>
    %c0_50 = arith.constant 0 : index
    %c0_51 = arith.constant 0 : index
    %94 = vector.load %arg11[%c0_50, %c0_51] : memref<16x1xf32, #tpu.memory_space<vmem>>, vector<16x1xf32>
    %cst_52 = arith.constant dense<0.000000e+00> : vector<2x1xf32>
    %95 = tpu.matmul %93, %94, %cst_52 {dimension_numbers = #tpu.dot_dimension_numbers<[1], [0], [0], [1], [0, 0, 1, 1], [], []>} : vector<2x16xf32>, vector<16x1xf32>, vector<2x1xf32> -> vector<2x1xf32>
    %c0_53 = arith.constant 0 : index
    %c0_54 = arith.constant 0 : index
    %96 = vector.load %arg12[%c0_53, %c0_54] : memref<1x1xf32, #tpu.memory_space<vmem>>, vector<1x1xf32>
    %97 = vector.broadcast %96 : vector<1x1xf32> to vector<2x1xf32>
    %98 = arith.addf %95, %97 : vector<2x1xf32>
    %c0_55 = arith.constant 0 : index
    %c0_56 = arith.constant 0 : index
    %99 = vector.load %arg13[%c0_55, %c0_56] : memref<2x1xf32, #tpu.memory_space<vmem>>, vector<2x1xf32>
    tpu.vector_store %arg13[%c0_55, %c0_56], %98 {strides = array<i32>} : memref<2x1xf32, #tpu.memory_space<vmem>>, vector<2x1xf32>,
    return
  }
  func.func @transform_0(%arg0: i32) -> (i32, i32, i32) {
    %c0_i32 = arith.constant 0 : i32
    %c0_i32_0 = arith.constant 0 : i32
    %c0_i32_1 = arith.constant 0 : i32
    return %arg0, %c0_i32, %c0_i32_0 : i32, i32, i32
  }
  func.func @transform_1(%arg0: i32) -> (i32, i32, i32) {
    %c0_i32 = arith.constant 0 : i32
    %c0_i32_0 = arith.constant 0 : i32
    %c0_i32_1 = arith.constant 0 : i32
    return %arg0, %c0_i32, %c0_i32_0 : i32, i32, i32
  }
  func.func @transform_2(%arg0: i32) -> (i32, i32) {
    %c0_i32 = arith.constant 0 : i32
    %c0_i32_0 = arith.constant 0 : i32
    %c0_i32_1 = arith.constant 0 : i32
    return %c0_i32, %c0_i32_0 : i32, i32
  }
  func.func @transform_3(%arg0: i32) -> (i32, i32) {
    %c0_i32 = arith.constant 0 : i32
    %c0_i32_0 = arith.constant 0 : i32
    %c0_i32_1 = arith.constant 0 : i32
    return %c0_i32, %c0_i32_0 : i32, i32
  }
  func.func @transform_4(%arg0: i32) -> (i32, i32) {
    %c0_i32 = arith.constant 0 : i32
    %c0_i32_0 = arith.constant 0 : i32
    %c0_i32_1 = arith.constant 0 : i32
    return %c0_i32, %c0_i32_0 : i32, i32
  }
  func.func @transform_5(%arg0: i32) -> (i32, i32) {
    %c0_i32 = arith.constant 0 : i32
    %c0_i32_0 = arith.constant 0 : i32
    %c0_i32_1 = arith.constant 0 : i32
    return %c0_i32, %c0_i32_0 : i32, i32
  }
  func.func @transform_6(%arg0: i32) -> (i32, i32) {
    %c0_i32 = arith.constant 0 : i32
    %c0_i32_0 = arith.constant 0 : i32
    %c0_i32_1 = arith.constant 0 : i32
    return %c0_i32, %c0_i32_0 : i32, i32
  }
  func.func @transform_7(%arg0: i32) -> (i32, i32) {
    %c0_i32 = arith.constant 0 : i32
    %c0_i32_0 = arith.constant 0 : i32
    %c0_i32_1 = arith.constant 0 : i32
    return %c0_i32, %c0_i32_0 : i32, i32
  }
  func.func @transform_8(%arg0: i32) -> (i32, i32) {
    %c0_i32 = arith.constant 0 : i32
    %c0_i32_0 = arith.constant 0 : i32
    %c0_i32_1 = arith.constant 0 : i32
    return %c0_i32, %c0_i32_0 : i32, i32
  }
  func.func @transform_9(%arg0: i32) -> (i32, i32) {
    %c0_i32 = arith.constant 0 : i32
    %c0_i32_0 = arith.constant 0 : i32
    %c0_i32_1 = arith.constant 0 : i32
    return %c0_i32, %c0_i32_0 : i32, i32
  }
  func.func @transform_10(%arg0: i32) -> (i32, i32) {
    %c0_i32 = arith.constant 0 : i32
    %c0_i32_0 = arith.constant 0 : i32
    %c0_i32_1 = arith.constant 0 : i32
    return %c0_i32, %c0_i32_0 : i32, i32
  }
  func.func @transform_11(%arg0: i32) -> (i32, i32) {
    %c0_i32 = arith.constant 0 : i32
    %c0_i32_0 = arith.constant 0 : i32
    %c0_i32_1 = arith.constant 0 : i32
    return %c0_i32, %c0_i32_0 : i32, i32
  }
  func.func @transform_12(%arg0: i32) -> (i32, i32) {
    %c0_i32 = arith.constant 0 : i32
    %c0_i32_0 = arith.constant 0 : i32
    return %arg0, %c0_i32 : i32, i32
  }
}

</mosaic_0001>

<bundles_post_ra>
// kernel: tpu_custom_call.1
= control target key start
LH: loop header
LB: loop body
LE: loop exit
PB: predicated region body
PF: predicated region fallthrough
CT: control target
= control target key end

     0   :  { %s3378_s0 = inlined_call_operand.hbm [shape: bf16[2,8,8], index: 0, kind: input, shape index: {}]   ;;  %s3379_s1 = inlined_call_operand.hbm [shape: f32[2,8,4], index: 1, kind: input, shape index: {}]   ;;  %s3380_s2 = inlined_call_operand.hbm [shape: bf16[20,32], index: 2, kind: input, shape index: {}]   ;;  %s3381_s3 = inlined_call_operand.hbm [shape: f32[1,32], index: 3, kind: input, shape index: {}]   ;;  %s3382_s4 = inlined_call_operand.hbm [shape: bf16[160,64], index: 4, kind: input, shape index: {}]   ;;  %s3383_s5 = inlined_call_operand.hbm [shape: f32[1,64], index: 5, kind: input, shape index: {}]   ;;  %s3384_s6 = inlined_call_operand.hbm [shape: bf16[320,64], index: 6, kind: input, shape index: {}]   ;;  %s3385_s7 = inlined_call_operand.hbm [shape: f32[1,64], index: 7, kind: input, shape index: {}]   ;;  %s3386_s8 = inlined_call_operand.hbm [shape: f32[64,16], index: 8, kind: input, shape index: {}]   ;;  %s3387_s9 = inlined_call_operand.hbm [shape: f32[1,16], index: 9, kind: input, shape index: {}]   ;;  %s3388_s10 = inlined_call_operand.hbm [shape: f32[16,1], index: 10, kind: input, shape index: {}]   ;;  %s3389_s11 = inlined_call_operand.<no memory space> [shape: f32[1,1], index: 11, kind: input, shape index: {}]   ;;  %s3390_s12 = inlined_call_operand.hbm [shape: f32[2,1], index: 12, kind: output, shape index: {}]  }
   0x1   :  { %v17_v0 = vstv %s3389_s11 }
   0x2   :  { %18 = vst [vmem:[#allocation2] sm:$0x1] %v17_v0 }
   0x3   :  { %19 = vsyncpa [#allocation4], 0 }
   0x4   :  { %20 = vsyncpa [#allocation7], 0 }
   0x5   :  { %21 = vsyncpa [#allocation10], 0 }
   0x6   :  { %22 = vsyncpa [#allocation13], 0 }
   0x7   :  { %23 = vsyncpa [#allocation16], 0 }
   0x8   :  { %24 = vsyncpa [#allocation19], 0 }
   0x9   :  { %25 = vsyncpa [#allocation5], 0  ;;  %s2850_s23 = smov [#allocation6]   ;;  %s2572_s27 = scalar_lea.hbm %s3379_s1, 256 }
   0xa   :  { %s43_s24 = sshll.u32 %s2850_s23, 4  ;;  %p2573_p0 = scmp.ne.s32.totalorder %s3379_s1, %s2572_s27  ;;  %s44_s24 = int_to_ptr.vmem [resolvable:$true] %s43_s24 }
   0xb   :  { %p2576_p1 = scmp.lt.u32.totalorder %s2572_s27, %s3379_s1 }
   0xd   :  { %p2578_p2 = pnand %p2576_p1, %p2573_p0 }
   0xf   :  { %2581 = shalt.err (!%p2578_p2)
}
  0x10   :  { %s2582_s13 = scalar_lea.vmem %s44_s24, 256  ;;  %p2587_p4 = scmp.lt.s32.totalorder %s44_s24, %s44_s24 }
  0x11   :  { %p2583_p3 = scmp.ne.s32.totalorder %s44_s24, %s2582_s13  ;;  %p2588_p5 = scmp.lt.s32.totalorder %s2582_s13, %s2582_s13 }
  0x13   :  { %p2589_p6 = por %p2588_p5, %p2587_p4 }
  0x15   :  { %p2590_p7 = pnand %p2589_p6, %p2583_p3 }
  0x17   :  { %2593 = shalt.err (!%p2590_p7)
}
  0x18   :  { %s2851_s14 = smov 128   ;;  %s2852_s15 = smov 8  }
  0x19   :  { %49 = dma.hbm_to_vmem [thread:$0]  %s3379_s1, 256, %s44_s24, [#allocation7], %s2851_s14, %s2851_s14, %s2852_s15  }
  0x1a   :  { %s2853_s18 = smov [#allocation9]   ;;  %s2854_s20 = smov [#allocation12]  }
  0x1b   :  { %s68_s19 = sshll.u32 %s2853_s18, 4  ;;  %s90_s21 = sshll.u32 %s2854_s20, 4  ;;  %s69_s19 = int_to_ptr.vmem [resolvable:$true] %s68_s19  ;;  %s91_s21 = int_to_ptr.vmem [resolvable:$true] %s90_s21 }
  0x1c   :  { %s2594_s25 = scalar_lea.hbm %s3381_s3, 16 }
  0x1d   :  { %p2595_p8 = scmp.ne.s32.totalorder %s3381_s3, %s2594_s25  ;;  %p2598_p9 = scmp.lt.u32.totalorder %s2594_s25, %s3381_s3 }
  0x1f   :  { %p2600_p10 = pnand %p2598_p9, %p2595_p8 }
  0x21   :  { %2603 = shalt.err (!%p2600_p10)
}
  0x22   :  { %s2604_s1 = scalar_lea.vmem %s69_s19, 16  ;;  %s2608_s24 = scalar_lea.vmem %s69_s19, 32 }
  0x23   :  { %p2605_p11 = scmp.ne.s32.totalorder %s69_s19, %s2604_s1  ;;  %p2609_p12 = scmp.lt.s32.totalorder %s69_s19, %s69_s19 }
  0x24   :  { %p2610_p13 = scmp.lt.s32.totalorder %s2608_s24, %s2604_s1 }
  0x26   :  { %p2611_p0 = por %p2610_p13, %p2609_p12 }
  0x28   :  { %p2612_p1 = pnand %p2611_p0, %p2605_p11 }
  0x2a   :  { %2615 = shalt.err (!%p2612_p1)
}
  0x2b   :  { %71 = dma.hbm_to_vmem [thread:$0]  %s3381_s3, 16, %s69_s19, [#allocation10]  }
  0x2c   :  { %s2616_s17 = scalar_lea.hbm %s3383_s5, 16 }
  0x2d   :  { %p2617_p2 = scmp.ne.s32.totalorder %s3383_s5, %s2616_s17  ;;  %p2620_p3 = scmp.lt.u32.totalorder %s2616_s17, %s3383_s5 }
  0x2f   :  { %p2622_p4 = pnand %p2620_p3, %p2617_p2 }
  0x31   :  { %2625 = shalt.err (!%p2622_p4)
}
  0x32   :  { %s2626_s25 = scalar_lea.vmem %s91_s21, 16  ;;  %s2630_s26 = scalar_lea.vmem %s91_s21, 32 }
  0x33   :  { %p2627_p5 = scmp.ne.s32.totalorder %s91_s21, %s2626_s25  ;;  %p2631_p6 = scmp.lt.s32.totalorder %s91_s21, %s91_s21 }
  0x34   :  { %p2632_p7 = scmp.lt.s32.totalorder %s2630_s26, %s2626_s25 }
  0x36   :  { %p2633_p8 = por %p2632_p7, %p2631_p6 }
  0x38   :  { %p2634_p9 = pnand %p2633_p8, %p2627_p5 }
  0x3a   :  { %2637 = shalt.err (!%p2634_p9)
}
  0x3b   :  { %93 = dma.hbm_to_vmem [thread:$0]  %s3383_s5, 16, %s91_s21, [#allocation13]  }
  0x3c   :  { %s2855_s27 = smov [#allocation15]   ;;  %s2856_s29 = smov [#allocation18]  }
  0x3d   :  { %s112_s28 = sshll.u32 %s2855_s27, 4  ;;  %s134_s1 = sshll.u32 %s2856_s29, 4  ;;  %s113_s28 = int_to_ptr.vmem [resolvable:$true] %s112_s28  ;;  %s135_s1 = int_to_ptr.vmem [resolvable:$true] %s134_s1 }
  0x3e   :  { %s2638_s30 = scalar_lea.hbm %s3385_s7, 16 }
  0x3f   :  { %p2639_p10 = scmp.ne.s32.totalorder %s3385_s7, %s2638_s30  ;;  %p2642_p11 = scmp.lt.u32.totalorder %s2638_s30, %s3385_s7 }
  0x41   :  { %p2644_p12 = pnand %p2642_p11, %p2639_p10 }
  0x43   :  { %2647 = shalt.err (!%p2644_p12)
}
  0x44   :  { %s2648_s5 = scalar_lea.vmem %s113_s28, 16  ;;  %s2652_s21 = scalar_lea.vmem %s113_s28, 32 }
  0x45   :  { %p2649_p13 = scmp.ne.s32.totalorder %s113_s28, %s2648_s5  ;;  %p2653_p0 = scmp.lt.s32.totalorder %s113_s28, %s113_s28 }
  0x46   :  { %p2654_p1 = scmp.lt.s32.totalorder %s2652_s21, %s2648_s5 }
  0x48   :  { %p2655_p2 = por %p2654_p1, %p2653_p0 }
  0x4a   :  { %p2656_p3 = pnand %p2655_p2, %p2649_p13 }
  0x4c   :  { %2659 = shalt.err (!%p2656_p3)
}
  0x4d   :  { %115 = dma.hbm_to_vmem [thread:$0]  %s3385_s7, 16, %s113_s28, [#allocation16]  }
  0x4e   :  { %s2660_s26 = scalar_lea.hbm %s3387_s9, 16 }
  0x4f   :  { %p2661_p4 = scmp.ne.s32.totalorder %s3387_s9, %s2660_s26  ;;  %p2664_p5 = scmp.lt.u32.totalorder %s2660_s26, %s3387_s9 }
  0x51   :  { %p2666_p6 = pnand %p2664_p5, %p2661_p4 }
  0x53   :  { %2669 = shalt.err (!%p2666_p6)
}
  0x54   :  { %s2670_s24 = scalar_lea.vmem %s135_s1, 16  ;;  %s2674_s11 = scalar_lea.vmem %s135_s1, 32 }
  0x55   :  { %p2671_p7 = scmp.ne.s32.totalorder %s135_s1, %s2670_s24  ;;  %p2675_p8 = scmp.lt.s32.totalorder %s135_s1, %s135_s1 }
  0x56   :  { %p2676_p9 = scmp.lt.s32.totalorder %s2674_s11, %s2670_s24 }
  0x58   :  { %p2677_p10 = por %p2676_p9, %p2675_p8 }
  0x5a   :  { %p2678_p11 = pnand %p2677_p10, %p2671_p7 }
  0x5c   :  { %2681 = shalt.err (!%p2678_p11)
}
  0x5d   :  { %137 = dma.hbm_to_vmem [thread:$0]  %s3387_s9, 16, %s135_s1, [#allocation19]  }
  0x5e   :  { %s2857_s30 = smov [#allocation3]   ;;  %s2682_s18 = scalar_lea.hbm %s3378_s0, 128 }
  0x5f   :  { %s31_s13 = sshll.u32 %s2857_s30, 4  ;;  %p2683_p12 = scmp.ne.s32.totalorder %s3378_s0, %s2682_s18  ;;  %s32_s13 = int_to_ptr.vmem [resolvable:$true] %s31_s13 }
  0x60   :  { %p2686_p13 = scmp.lt.u32.totalorder %s2682_s18, %s3378_s0 }
  0x62   :  { %p2688_p0 = pnand %p2686_p13, %p2683_p12 }
  0x64   :  { %2691 = shalt.err (!%p2688_p0)
}
  0x65   :  { %s2692_s23 = scalar_lea.vmem %s32_s13, 128  ;;  %p2697_p2 = scmp.lt.s32.totalorder %s32_s13, %s32_s13 }
  0x66   :  { %p2693_p1 = scmp.ne.s32.totalorder %s32_s13, %s2692_s23  ;;  %p2698_p3 = scmp.lt.s32.totalorder %s2692_s23, %s2692_s23 }
  0x68   :  { %p2699_p4 = por %p2698_p3, %p2697_p2 }
  0x6a   :  { %p2700_p5 = pnand %p2699_p4, %p2693_p1 }
  0x6c   :  { %2703 = shalt.err (!%p2700_p5)
}
  0x6d   :  { %s2858_s9 = smov 64   ;;  %s2859_s1 = smov 4  }
  0x6e   :  { %37 = dma.hbm_to_vmem [thread:$0]  %s3378_s0, 128, %s32_s13, [#allocation4], %s2858_s9, %s2858_s9, %s2859_s1  }
  0x6f   :  { %s2860_s3 = smov [#allocation8]   ;;  %s2861_s27 = smov [#allocation11]  }
  0x70   :  { %s55_s19 = sshll.u32 %s2860_s3, 4  ;;  %s77_s29 = sshll.u32 %s2861_s27, 4  ;;  %s56_s19 = int_to_ptr.vmem [resolvable:$true] %s55_s19  ;;  %s3020_s29 = int_to_ptr.vmem [resolvable:$true] %s77_s29 }
  0x71   :  { %s2704_s7 = scalar_lea.hbm %s3380_s2, 192 }
  0x72   :  { %p2705_p6 = scmp.ne.s32.totalorder %s3380_s2, %s2704_s7  ;;  %p2708_p7 = scmp.lt.u32.totalorder %s2704_s7, %s3380_s2 }
  0x74   :  { %p2710_p8 = pnand %p2708_p7, %p2705_p6 }
  0x76   :  { %2713 = shalt.err (!%p2710_p8)
}
  0x77   :  { %s2714_s0 = scalar_lea.vmem %s56_s19, 192  ;;  %p2719_p10 = scmp.lt.s32.totalorder %s56_s19, %s56_s19 }
  0x78   :  { %p2715_p9 = scmp.ne.s32.totalorder %s56_s19, %s2714_s0  ;;  %p2720_p11 = scmp.lt.s32.totalorder %s2714_s0, %s2714_s0 }
  0x7a   :  { %p2721_p12 = por %p2720_p11, %p2719_p10 }
  0x7c   :  { %p2722_p13 = pnand %p2721_p12, %p2715_p9 }
  0x7e   :  { %2725 = shalt.err (!%p2722_p13)
}
  0x7f   :  { %61 = dma.hbm_to_vmem [thread:$0]  %s3380_s2, 192, %s56_s19, [#allocation7], %s2858_s9, %s2858_s9, %s2859_s1  }
  0x80   :  { %s2726_s20 = scalar_lea.hbm %s3382_s4, 1280 }
  0x81   :  { %p2727_p0 = scmp.ne.s32.totalorder %s3382_s4, %s2726_s20  ;;  %p2730_p1 = scmp.lt.u32.totalorder %s2726_s20, %s3382_s4 }
  0x83   :  { %p2732_p2 = pnand %p2730_p1, %p2727_p0 }
  0x85   :  { %2735 = shalt.err (!%p2732_p2)
}
  0x86   :  { %s2736_s3 = scalar_lea.vmem %s3020_s29, 1280  ;;  %p2741_p4 = scmp.lt.s32.totalorder %s3020_s29, %s3020_s29 }
  0x87   :  { %p2737_p3 = scmp.ne.s32.totalorder %s3020_s29, %s2736_s3  ;;  %p2742_p5 = scmp.lt.s32.totalorder %s2736_s3, %s2736_s3 }
  0x89   :  { %p2743_p6 = por %p2742_p5, %p2741_p4 }
  0x8b   :  { %p2744_p7 = pnand %p2743_p6, %p2737_p3 }
  0x8d   :  { %2747 = shalt.err (!%p2744_p7)
}
  0x8e   :  { %83 = dma.hbm_to_vmem [thread:$0]  %s3382_s4, 1280, %s3020_s29, [#allocation10], %s2858_s9, %s2858_s9, %s2859_s1  }
  0x8f   :  { %s2862_s27 = smov [#allocation14]   ;;  %s2863_s11 = smov [#allocation17]  }
  0x90   :  { %s99_s24 = sshll.u32 %s2862_s27, 4  ;;  %s121_s7 = sshll.u32 %s2863_s11, 4  ;;  %s100_s24 = int_to_ptr.vmem [resolvable:$true] %s99_s24  ;;  %s3057_s7 = int_to_ptr.vmem [resolvable:$true] %s121_s7 }
  0x91   :  { %s2748_s16 = scalar_lea.hbm %s3384_s6, 2560 }
  0x92   :  { %p2749_p8 = scmp.ne.s32.totalorder %s3384_s6, %s2748_s16  ;;  %p2752_p9 = scmp.lt.u32.totalorder %s2748_s16, %s3384_s6 }
  0x94   :  { %p2754_p10 = pnand %p2752_p9, %p2749_p8 }
  0x96   :  { %2757 = shalt.err (!%p2754_p10)
}
  0x97   :  { %s2758_s4 = scalar_lea.vmem %s100_s24, 2560  ;;  %p2763_p12 = scmp.lt.s32.totalorder %s100_s24, %s100_s24 }
  0x98   :  { %p2759_p11 = scmp.ne.s32.totalorder %s100_s24, %s2758_s4  ;;  %p2764_p13 = scmp.lt.s32.totalorder %s2758_s4, %s2758_s4 }
  0x9a   :  { %p2765_p0 = por %p2764_p13, %p2763_p12 }
  0x9c   :  { %p2766_p1 = pnand %p2765_p0, %p2759_p11 }
  0x9e   :  { %2769 = shalt.err (!%p2766_p1)
}
  0x9f   :  { %105 = dma.hbm_to_vmem [thread:$0]  %s3384_s6, 2560, %s100_s24, [#allocation13], %s2858_s9, %s2858_s9, %s2859_s1  }
  0xa0   :  { %s2770_s22 = scalar_lea.hbm %s3386_s8, 1024 }
  0xa1   :  { %p2771_p2 = scmp.ne.s32.totalorder %s3386_s8, %s2770_s22  ;;  %p2774_p3 = scmp.lt.u32.totalorder %s2770_s22, %s3386_s8 }
  0xa3   :  { %p2776_p4 = pnand %p2774_p3, %p2771_p2 }
  0xa5   :  { %2779 = shalt.err (!%p2776_p4)
}
  0xa6   :  { %s2780_s2 = scalar_lea.vmem %s3057_s7, 1024  ;;  %p2785_p6 = scmp.lt.s32.totalorder %s3057_s7, %s3057_s7 }
  0xa7   :  { %p2781_p5 = scmp.ne.s32.totalorder %s3057_s7, %s2780_s2  ;;  %p2786_p7 = scmp.lt.s32.totalorder %s2780_s2, %s2780_s2 }
  0xa9   :  { %p2787_p8 = por %p2786_p7, %p2785_p6 }
  0xab   :  { %p2788_p9 = pnand %p2787_p8, %p2781_p5 }
  0xad   :  { %2791 = shalt.err (!%p2788_p9)
}
  0xae   :  { %127 = dma.hbm_to_vmem [thread:$0]  %s3386_s8, 1024, %s3057_s7, [#allocation16], %s2851_s14, %s2851_s14, %s2852_s15  }
  0xaf   :  { %s2864_s27 = smov [#allocation20]   ;;  %s2792_s30 = scalar_lea.hbm %s3388_s10, 256 }
  0xb0   :  { %s143_s24 = sshll.u32 %s2864_s27, 4  ;;  %p2793_p10 = scmp.ne.s32.totalorder %s3388_s10, %s2792_s30  ;;  %s144_s24 = int_to_ptr.vmem [resolvable:$true] %s143_s24 }
  0xb1   :  { %p2796_p11 = scmp.lt.u32.totalorder %s2792_s30, %s3388_s10 }
  0xb3   :  { %p2798_p12 = pnand %p2796_p11, %p2793_p10 }
  0xb5   :  { %2801 = shalt.err (!%p2798_p12)
}
  0xb6   :  { %s2802_s18 = scalar_lea.vmem %s144_s24, 256  ;;  %p2807_p0 = scmp.lt.s32.totalorder %s144_s24, %s144_s24 }
  0xb7   :  { %p2803_p13 = scmp.ne.s32.totalorder %s144_s24, %s2802_s18  ;;  %p2808_p1 = scmp.lt.s32.totalorder %s2802_s18, %s2802_s18 }
  0xb9   :  { %p2809_p2 = por %p2808_p1, %p2807_p0 }
  0xbb   :  { %p2810_p3 = pnand %p2809_p2, %p2803_p13 }
  0xbd   :  { %2813 = shalt.err (!%p2810_p3)
}
  0xbe   :  { %149 = dma.hbm_to_vmem [thread:$0]  %s3388_s10, 256, %s144_s24, [#allocation19], %s2851_s14, %s2851_s14, %s2852_s15  }
  0xbf   :  { %2836 = dma.done.wait [#allocation4], 128  }
  0xc0   :  { %2837 = vsyncadd [#allocation4], 4294967168 }
  0xc1   :  { %2838 = dma.done.wait [#allocation7], 448  }
  0xc2   :  { %2839 = vsyncadd [#allocation7], 4294966848 }
  0xc3   :  { %2840 = dma.done.wait [#allocation10], 1296  }
  0xc4   :  { %2841 = vsyncadd [#allocation10], 4294966000 }
  0xc5   :  { %2842 = dma.done.wait [#allocation13], 2576  }
  0xc6   :  { %2843 = vsyncadd [#allocation13], 4294964720 }
  0xc7   :  { %2844 = dma.done.wait [#allocation16], 1040  }
  0xc8   :  { %2845 = vsyncadd [#allocation16], 4294966256 }
  0xc9   :  { %2846 = dma.done.wait [#allocation19], 272  }
  0xca   :  { %2847 = vsyncadd [#allocation19], 4294967024  ;;  %v2865_v1 = vmov 0.0   ;;  %vm2866_vm0 = vmmov 0   ;;  %v3115_v2 = vld [vmem:[#allocation6] sm:$0xff]  ;;  %vm196_vm1 = vcmask 1043456  }
  0xcb   :  { %2266 = vmatprep.subr.bf16.mxu0 %v2865_v1  ;;  %2272 = vmatprep.subr.bf16.mxu1 %v2865_v1  ;;  %v3117_v3 = vld [vmem:[#allocation6 + $0x8] sm:$0xff]  ;;  %v190_v4 = vpack.c.bf16 %v3115_v2, %v3115_v2  ;;  %vm192_vm2 = vcmask 64512   ;;  %v3123_v6 = vld [vmem:[#allocation3] sm:$0xf]  ;;  %v3125_v7 = vld [vmem:[#allocation3 + $0x4] sm:$0xf] }
  0xcc   :  { %2268 = vmatprep.mubr.msk.bf16.mxu0 %vm2866_vm0, %v2865_v1  ;;  %2274 = vmatprep.mubr.msk.bf16.mxu1 %vm2866_vm0, %v2865_v1  ;;  %v191_v5 = vpack.c.bf16 %v3117_v3, %v3117_v3  ;;  %s2867_s10 = smov 12   ;;  %v2540_v57 = vld [vmem:[#allocation8] sm:$0xff]   ;;  %v2541_v58 = vld [vmem:[#allocation8 + $0x8] ss:$0 sps:$4 sm:$0x33]   ;;  %vm635_vm3 = vcmask 1041408  }
  0xcd   :  { %v198_v8 = vsel %vm196_vm1, %v190_v4, 0  ;;  %v637_v59 = vsel %vm635_vm3, %v2541_v58, 0  ;;  %s2868_s14 = smov 16   ;;  %vm594_vm4 = vcmask 31744   ;;  %vm599_vm5 = vcmask 97280  }
  0xce   :  { %v244_v9 = vsel %vm196_vm1, %v191_v5, 0  ;;  %2267 = vmatpush3.bf16.msra.mxu0 %v198_v8  ;;  %vm602_vm6 = vcmask 130048   ;;  %vm631_vm7 = vcmask 162816   ;;  %vm1070_vm8 = vcmask 261120  }
  0xcf   :  { %2273 = vmatpush3.bf16.msra.mxu1 %v244_v9  ;;  %2278 = vmatprep.subr.bf16.mxu0 %v2865_v1  ;;  %vm1073_vm9 = vcmask 523264   ;;  %vm1076_vm10 = vcmask 785408   ;;  %vm1919_vm11 = vcmask 1041409   ;;  %vm2076_vm12 = vcmask 1024  }
  0xd0   :  { %2284 = vmatprep.subr.bf16.mxu1 %v2865_v1 }
  0xd1   :  { %2269 = vmatmul.mubr.msk.bf16.vlgmr.msra.gmra.mrb[0].mxu0 %vm192_vm2, %v3123_v6 }
  0xd2   :  { %2275 = vmatmul.mubr.msk.bf16.vlgmr.msra.gmra.mrb[0].mxu1 %vm192_vm2, %v3125_v7  ;;  %2280 = vmatprep.mubr.msk.bf16.mxu0 %vm2866_vm0, %v2865_v1 }
  0xd3   :  { %2286 = vmatprep.mubr.msk.bf16.mxu1 %vm2866_vm0, %v2865_v1 }
 0x1a4   :  { %v234_v10 = vpop.f32.mrb[0].mxu0 }
 0x1a5   :  { %v280_v11 = vpop.f32.mrb[0].mxu1  ;;  %v286_v12 = vpack.c.bf16 %v234_v10, %v234_v10  ;;  %v2270_v14 = vpop.f32.mrb[1].mxu0 }
 0x1a6   :  { %v287_v13 = vpack.c.bf16 %v280_v11, %v280_v11  ;;  %v2276_v15 = vpop.f32.mrb[1].mxu1  ;;  %v2495_v16 = vpack.i.bf16 %v280_v11, %v234_v10  ;;  %v237_v17 = vpop.f32.mrb[2].mxu0 }
 0x1a7   :  { %v283_v18 = vpop.f32.mrb[2].mxu1  ;;  %v2271_v20 = vpop.f32.mrb[3].mxu0  ;;  %v289_v21 = vsel %vm196_vm1, %v286_v12, 0 }
 0x1a8   :  { %v2277_v19 = vpop.f32.mrb[3].mxu1  ;;  %2496 = vrot.lane.b32.xlu0 %v2495_v16, %s2859_s1  ;;  %v332_v22 = vsel %vm196_vm1, %v287_v13, 0  ;;  %2279 = vmatpush3.bf16.msra.mxu0 %v289_v21  ;;  %s2870_s1 = smov 96  }
 0x1a9   :  { %2285 = vmatpush3.bf16.msra.mxu1 %v332_v22  ;;  %2290 = vmatprep.subr.bf16.mxu0 %v2865_v1 }
 0x1aa   :  { %2296 = vmatprep.subr.bf16.mxu1 %v2865_v1 }
 0x1ab   :  { %2281 = vmatmul.mubr.msk.bf16.vlgmr.msra.gmra.mrb[4].mxu0 %vm192_vm2, %v3123_v6 }
 0x1ac   :  { %2287 = vmatmul.mubr.msk.bf16.vlgmr.msra.gmra.mrb[4].mxu1 %vm192_vm2, %v3125_v7  ;;  %2292 = vmatprep.mubr.msk.bf16.mxu0 %vm2866_vm0, %v2865_v1 }
 0x1ad   :  { %2298 = vmatprep.mubr.msk.bf16.mxu1 %vm2866_vm0, %v2865_v1 }
 0x21a   :  { %v2497_v14 = vpop.permute.xlu0 %2496 }
 0x21b   :  { %v2499_v17 = vunpack.i.h.bf16 %v2497_v14  ;;  %v2498_v18 = vunpack.i.l.bf16 %v2497_v14 }
 0x27e   :  { %v325_v23 = vpop.f32.mrb[4].mxu0 }
 0x27f   :  { %v368_v24 = vpop.f32.mrb[4].mxu1  ;;  %v374_v25 = vmul.f32 2.0, %v325_v23  ;;  %v2282_v27 = vpop.f32.mrb[5].mxu0  ;;  %v596_v23 = vsel %vm594_vm4, %v3117_v3, %v2499_v17 }
 0x280   :  { %v375_v26 = vmul.f32 2.0, %v368_v24  ;;  %v2288_v28 = vpop.f32.mrb[5].mxu1  ;;  %v328_v29 = vpop.f32.mrb[6].mxu0  ;;  %v595_v24 = vsel %vm594_vm4, %v3115_v2, %v2498_v18 }
 0x281   :  { %v371_v30 = vpop.f32.mrb[6].mxu1  ;;  %v3153_v31 = vsub.f32 %v374_v25, %v3115_v2  ;;  %v2283_v33 = vpop.f32.mrb[7].mxu0  ;;  %v2106_v2 = vld [vmem:[#allocation9] ss:$0 sm:$0xff] }
 0x282   :  { %v3156_v32 = vsub.f32 %v375_v26, %v3117_v3  ;;  %v2289_v34 = vpop.f32.mrb[7].mxu1 }
 0x283   :  { %v378_v36 = vpack.c.bf16 %v3153_v31, %v3153_v31 }
 0x284   :  { %v2500_v35 = vpack.i.bf16 %v3156_v32, %v3153_v31  ;;  %v379_v37 = vpack.c.bf16 %v3156_v32, %v3156_v32 }
 0x285   :  { %v381_v38 = vsel %vm196_vm1, %v378_v36, 0 }
 0x286   :  { %2501 = vrot.lane.b32.xlu0 %v2500_v35, %s2852_s15  ;;  %v424_v39 = vsel %vm196_vm1, %v379_v37, 0  ;;  %2291 = vmatpush3.bf16.msra.mxu0 %v381_v38  ;;  %s2869_s15 = smov 32  }
 0x287   :  { %2297 = vmatpush3.bf16.msra.mxu1 %v424_v39  ;;  %2302 = vmatprep.subr.bf16.mxu0 %v2865_v1 }
 0x288   :  { %2308 = vmatprep.subr.bf16.mxu1 %v2865_v1 }
 0x289   :  { %2293 = vmatmul.mubr.msk.bf16.vlgmr.msra.gmra.mrb[8].mxu0 %vm192_vm2, %v3123_v6 }
 0x28a   :  { %2299 = vmatmul.mubr.msk.bf16.vlgmr.msra.gmra.mrb[8].mxu1 %vm192_vm2, %v3125_v7  ;;  %2304 = vmatprep.mubr.msk.bf16.mxu0 %vm2866_vm0, %v2865_v1 }
 0x28b   :  { %2310 = vmatprep.mubr.msk.bf16.mxu1 %vm2866_vm0, %v2865_v1 }
 0x2f8   :  { %v2502_v15 = vpop.permute.xlu0 %2501 }
 0x2f9   :  { %v2504_v19 = vunpack.i.h.bf16 %v2502_v15  ;;  %v2503_v20 = vunpack.i.l.bf16 %v2502_v15 }
 0x2fb   :  { %v598_v26 = vsel %vm192_vm2, %v596_v23, %v2504_v19  ;;  %v597_v27 = vsel %vm192_vm2, %v595_v24, %v2503_v20 }
 0x35c   :  { %v417_v40 = vpop.f32.mrb[8].mxu0 }
 0x35d   :  { %v460_v41 = vpop.f32.mrb[8].mxu1  ;;  %v466_v42 = vmul.f32 2.0, %v417_v40  ;;  %v2294_v44 = vpop.f32.mrb[9].mxu0 }
 0x35e   :  { %v467_v43 = vmul.f32 2.0, %v460_v41  ;;  %v2300_v45 = vpop.f32.mrb[9].mxu1  ;;  %v420_v46 = vpop.f32.mrb[10].mxu0 }
 0x35f   :  { %v463_v47 = vpop.f32.mrb[10].mxu1  ;;  %v468_v48 = vsub.f32 %v466_v42, %v234_v10  ;;  %v2295_v50 = vpop.f32.mrb[11].mxu0 }
 0x360   :  { %v469_v49 = vsub.f32 %v467_v43, %v280_v11  ;;  %v2301_v51 = vpop.f32.mrb[11].mxu1 }
 0x361   :  { %v470_v52 = vpack.c.bf16 %v468_v48, %v468_v48 }
 0x362   :  { %v471_v53 = vpack.c.bf16 %v469_v49, %v469_v49  ;;  %v2505_v54 = vpack.i.bf16 %v469_v49, %v468_v48 }
 0x363   :  { %v473_v55 = vsel %vm196_vm1, %v470_v52, 0 }
 0x364   :  { %2506 = vrot.lane.b32.xlu1 %v2505_v54, %s2867_s10  ;;  %v516_v56 = vsel %vm196_vm1, %v471_v53, 0  ;;  %2303 = vmatpush3.bf16.msra.mxu0 %v473_v55 }
 0x365   :  { %2309 = vmatpush3.bf16.msra.mxu1 %v516_v56  ;;  %2314 = vmatprep.subr.bf16.mxu0 %v2865_v1 }
 0x366   :  { %2322 = vmatprep.subr.bf16.mxu1 %v2865_v1 }
 0x367   :  { %2305 = vmatmul.mubr.msk.bf16.vlgmr.msra.gmra.mrb[12].mxu0 %vm192_vm2, %v3123_v6 }
 0x368   :  { %2311 = vmatmul.mubr.msk.bf16.vlgmr.msra.gmra.mrb[12].mxu1 %vm192_vm2, %v3125_v7  ;;  %2318 = vmatprep.mubr.msk.bf16.mxu0 %vm2866_vm0, %v2865_v1 }
 0x369   :  { %2324 = vmatprep.mubr.msk.bf16.mxu1 %vm2866_vm0, %v2865_v1  ;;  %2315 = vmatpush3.bf16.msra.mxu0 %v2540_v57 }
 0x36a   :  { %2316 = vmatprep.subr.bf16.mxu0 %v2865_v1 }
 0x36d   :  { %2317 = vmatpush3.bf16.msra.mxu0 %v637_v59 }
 0x36e   :  { %2328 = vmatprep.subr.bf16.mxu0 %v2865_v1 }
 0x3d6   :  { %v2507_v16 = vpop.permute.xlu1 %2506 }
 0x3d7   :  { %v2509_v21 = vunpack.i.h.bf16 %v2507_v16  ;;  %v2508_v22 = vunpack.i.l.bf16 %v2507_v16 }
 0x3d9   :  { %v601_v30 = vsel %vm599_vm5, %v598_v26, %v2509_v21 }
 0x43a   :  { %v509_v60 = vpop.f32.mrb[12].mxu0 }
 0x43b   :  { %v552_v61 = vpop.f32.mrb[12].mxu1  ;;  %v558_v62 = vmul.f32 2.0, %v509_v60  ;;  %v2306_v0 = vpop.f32.mrb[13].mxu0 }
 0x43c   :  { %v559_v63 = vmul.f32 2.0, %v552_v61  ;;  %v2312_v4 = vpop.f32.mrb[13].mxu1  ;;  %v512_v5 = vpop.f32.mrb[14].mxu0 }
 0x43d   :  { %v555_v8 = vpop.f32.mrb[14].mxu1  ;;  %v560_v9 = vsub.f32 %v558_v62, %v3153_v31  ;;  %v2307_v11 = vpop.f32.mrb[15].mxu0  ;;  %v600_v31 = vsel %vm599_vm5, %v597_v27, %v2508_v22 }
 0x43e   :  { %v561_v10 = vsub.f32 %v559_v63, %v3156_v32  ;;  %v2313_v12 = vpop.f32.mrb[15].mxu1 }
 0x440   :  { %v2510_v13 = vpack.i.bf16 %v561_v10, %v560_v9 }
 0x442   :  { %2511 = vrot.lane.b32.xlu1 %v2510_v13, %s2868_s14 }
 0x4b4   :  { %v2512_v25 = vpop.permute.xlu1 %2511 }
 0x4b5   :  { %v2514_v28 = vunpack.i.h.bf16 %v2512_v25  ;;  %v2513_v29 = vunpack.i.l.bf16 %v2512_v25 }
 0x4b7   :  { %v604_v32 = vsel %vm602_vm6, %v601_v30, %v2514_v28  ;;  %v603_v33 = vsel %vm602_vm6, %v600_v31, %v2513_v29 }
 0x4b8   :  { %v2170_v34 = vpack.c.bf16 %v604_v32, %v603_v33  ;;  %v2542_v33 = vld [vmem:[#allocation11] sm:$0xff]  }
 0x4ba   :  { %2319 = vmatmul.mubr.msk.bf16.vlgmr.msra.gmra.mrb[16].mxu0 %vm631_vm7, %v2170_v34 }
 0x4bb   :  { %2330 = vmatprep.mubr.msk.bf16.mxu0 %vm2866_vm0, %v2865_v1 }
 0x58d   :  { %v673_v3 = vpop.f32.mrb[16].mxu0 }
 0x58e   :  { %v674_v35 = vadd.f32 %v2106_v2, %v673_v3  ;;  %v2320_v36 = vpop.f32.mrb[17].mxu0  ;;  %v2543_v3 = vld [vmem:[#allocation11 + $0x8] sm:$0xff]  }
 0x58f   :  { %v676_v37 = vpop.f32.mrb[18].mxu0  ;;  %v2545_v36 = vld [vmem:[#allocation11 + $0x18] sm:$0xff]  }
 0x590   :  { %v3201_v38 = vmax.f32 %v674_v35, 0.0  ;;  %v677_v39 = vadd.f32 %v2106_v2, %v676_v37  ;;  %v2321_v40 = vpop.f32.mrb[19].mxu0  ;;  %v2871_v2 = vmov 0   ;;  %v2544_v35 = vld [vmem:[#allocation11 + $0x10] sm:$0xff]   ;;  %v2546_v37 = vld [vmem:[#allocation11 + $0x20] sm:$0xff]  }
 0x591   :  { %v2548_v40 = vld [vmem:[#allocation11 + $0x30] sm:$0xff]  }
 0x592   :  { %v3203_v41 = vmax.f32 %v677_v39, 0.0  ;;  %v682_v42 = vpack.c.bf16 %v3201_v38, %v3201_v38  ;;  %v2547_v39 = vld [vmem:[#allocation11 + $0x28] sm:$0xff]  }
 0x594   :  { %v685_v43 = vsel %vm196_vm1, %v682_v42, 0  ;;  %v683_v44 = vpack.c.bf16 %v3203_v41, %v3203_v41  ;;  %v2549_v42 = vld [vmem:[#allocation11 + $0x38] sm:$0xff]  }
 0x595   :  { %2323 = vmatpush3.bf16.msra.mxu1 %v685_v43  ;;  %v2550_v43 = vld [vmem:[#allocation11 + $0x40] sm:$0xff]  }
 0x596   :  { %v728_v45 = vsel %vm196_vm1, %v683_v44, 0  ;;  %2334 = vmatprep.subr.bf16.mxu1 %v2865_v1  ;;  %v2551_v44 = vld [vmem:[#allocation11 + $0x48] sm:$0xff]  }
 0x597   :  { %2329 = vmatpush3.bf16.msra.mxu0 %v728_v45 }
 0x598   :  { %2325 = vmatmul.mubr.msk.bf16.vlgmr.msra.gmra.mrb[16].mxu1 %vm192_vm2, %v3123_v6  ;;  %2340 = vmatprep.subr.bf16.mxu0 %v2865_v1 }
 0x599   :  { %2336 = vmatprep.mubr.msk.bf16.mxu1 %vm2866_vm0, %v2865_v1 }
 0x59a   :  { %2331 = vmatmul.mubr.msk.bf16.vlgmr.msra.gmra.mrb[20].mxu0 %vm192_vm2, %v3125_v7 }
 0x59b   :  { %2342 = vmatprep.mubr.msk.bf16.mxu0 %vm2866_vm0, %v2865_v1 }
 0x66b   :  { %v721_v46 = vpop.f32.mrb[16].mxu1 }
 0x66c   :  { %v770_v47 = vpack.c.bf16 %v721_v46, %v721_v46  ;;  %v2326_v48 = vpop.f32.mrb[17].mxu1 }
 0x66d   :  { %v724_v49 = vpop.f32.mrb[18].mxu1  ;;  %v764_v50 = vpop.f32.mrb[20].mxu0 }
 0x66e   :  { %v2515_v51 = vpack.i.bf16 %v764_v50, %v721_v46  ;;  %v771_v52 = vpack.c.bf16 %v764_v50, %v764_v50  ;;  %v2327_v53 = vpop.f32.mrb[19].mxu1  ;;  %v2332_v54 = vpop.f32.mrb[21].mxu0  ;;  %v773_v55 = vsel %vm196_vm1, %v770_v47, 0 }
 0x66f   :  { %v767_v56 = vpop.f32.mrb[22].mxu0  ;;  %2335 = vmatpush3.bf16.msra.mxu1 %v773_v55 }
 0x670   :  { %2516 = vrot.lane.b32.xlu0 %v2515_v51, %s2869_s15  ;;  %v2333_v57 = vpop.f32.mrb[23].mxu0  ;;  %v816_v58 = vsel %vm196_vm1, %v771_v52, 0  ;;  %2346 = vmatprep.subr.bf16.mxu1 %v2865_v1 }
 0x671   :  { %2341 = vmatpush3.bf16.msra.mxu0 %v816_v58 }
 0x672   :  { %2337 = vmatmul.mubr.msk.bf16.vlgmr.msra.gmra.mrb[20].mxu1 %vm192_vm2, %v3123_v6  ;;  %2352 = vmatprep.subr.bf16.mxu0 %v2865_v1 }
 0x673   :  { %2348 = vmatprep.mubr.msk.bf16.mxu1 %vm2866_vm0, %v2865_v1 }
 0x674   :  { %2343 = vmatmul.mubr.msk.bf16.vlgmr.msra.gmra.mrb[24].mxu0 %vm192_vm2, %v3125_v7 }
 0x675   :  { %2354 = vmatprep.mubr.msk.bf16.mxu0 %vm2866_vm0, %v2865_v1 }
 0x6e2   :  { %v2517_v45 = vpop.permute.xlu0 %2516 }
 0x6e3   :  { %v2519_v48 = vunpack.i.h.bf16 %v2517_v45  ;;  %v2518_v49 = vunpack.i.l.bf16 %v2517_v45 }
 0x745   :  { %v809_v59 = vpop.f32.mrb[20].mxu1 }
 0x746   :  { %v858_v60 = vmul.f32 2.0, %v809_v59  ;;  %v2338_v61 = vpop.f32.mrb[21].mxu1 }
 0x747   :  { %v812_v62 = vpop.f32.mrb[22].mxu1  ;;  %v852_v63 = vpop.f32.mrb[24].mxu0 }
 0x748   :  { %v3234_v0 = vsub.f32 %v858_v60, %v3201_v38  ;;  %v859_v4 = vmul.f32 2.0, %v852_v63  ;;  %v2339_v5 = vpop.f32.mrb[23].mxu1  ;;  %v2344_v8 = vpop.f32.mrb[25].mxu0  ;;  %v1071_v62 = vsel %vm1070_vm8, %v3201_v38, %v2518_v49  ;;  %v1072_v63 = vsel %vm1070_vm8, %v3203_v41, %v2519_v48  ;;  %v2119_v38 = vld [vmem:[#allocation12] ss:$0 sm:$0xff] }
 0x749   :  { %v855_v9 = vpop.f32.mrb[26].mxu0 }
 0x74a   :  { %v3237_v10 = vsub.f32 %v859_v4, %v3203_v41  ;;  %v2345_v11 = vpop.f32.mrb[27].mxu0  ;;  %v862_v12 = vpack.c.bf16 %v3234_v0, %v3234_v0 }
 0x74c   :  { %v865_v13 = vsel %vm196_vm1, %v862_v12, 0  ;;  %v2520_v14 = vpack.i.bf16 %v3237_v10, %v3234_v0  ;;  %v863_v15 = vpack.c.bf16 %v3237_v10, %v3237_v10 }
 0x74d   :  { %2347 = vmatpush3.bf16.msra.mxu1 %v865_v13 }
 0x74e   :  { %2521 = vrot.lane.b32.xlu1 %v2520_v14, %s2858_s9  ;;  %v908_v16 = vsel %vm196_vm1, %v863_v15, 0  ;;  %2358 = vmatprep.subr.bf16.mxu1 %v2865_v1 }
 0x74f   :  { %2353 = vmatpush3.bf16.msra.mxu0 %v908_v16 }
 0x750   :  { %2349 = vmatmul.mubr.msk.bf16.vlgmr.msra.gmra.mrb[24].mxu1 %vm192_vm2, %v3123_v6  ;;  %2364 = vmatprep.subr.bf16.mxu0 %v2865_v1 }
 0x751   :  { %2360 = vmatprep.mubr.msk.bf16.mxu1 %vm2866_vm0, %v2865_v1 }
 0x752   :  { %2355 = vmatmul.mubr.msk.bf16.vlgmr.msra.gmra.mrb[28].mxu0 %vm192_vm2, %v3125_v7 }
 0x753   :  { %2366 = vmatprep.mubr.msk.bf16.mxu0 %vm2866_vm0, %v2865_v1 }
 0x823   :  { %v901_v17 = vpop.f32.mrb[24].mxu1 }
 0x824   :  { %v950_v18 = vmul.f32 2.0, %v901_v17  ;;  %v2350_v19 = vpop.f32.mrb[25].mxu1 }
 0x825   :  { %v904_v20 = vpop.f32.mrb[26].mxu1  ;;  %v944_v21 = vpop.f32.mrb[28].mxu0 }
 0x826   :  { %v952_v22 = vsub.f32 %v950_v18, %v721_v46  ;;  %v951_v23 = vmul.f32 2.0, %v944_v21  ;;  %v2351_v24 = vpop.f32.mrb[27].mxu1  ;;  %v2356_v25 = vpop.f32.mrb[29].mxu0 }
 0x827   :  { %v947_v26 = vpop.f32.mrb[30].mxu0  ;;  %v2522_v46 = vpop.permute.xlu1 %2521 }
 0x828   :  { %v954_v27 = vpack.c.bf16 %v952_v22, %v952_v22  ;;  %v953_v28 = vsub.f32 %v951_v23, %v764_v50  ;;  %v2357_v29 = vpop.f32.mrb[31].mxu0  ;;  %v2524_v50 = vunpack.i.h.bf16 %v2522_v46  ;;  %v2523_v51 = vunpack.i.l.bf16 %v2522_v46 }
 0x82a   :  { %v955_v30 = vpack.c.bf16 %v953_v28, %v953_v28  ;;  %v957_v31 = vsel %vm196_vm1, %v954_v27, 0  ;;  %v2525_v32 = vpack.i.bf16 %v953_v28, %v952_v22  ;;  %v1074_v5 = vsel %vm1073_vm9, %v1071_v62, %v2523_v51  ;;  %v2552_v62 = vld [vmem:[#allocation14 + $0x40] sm:$0xff]  }
 0x82b   :  { %2359 = vmatpush3.bf16.msra.mxu1 %v957_v31  ;;  %v1075_v8 = vsel %vm1073_vm9, %v1072_v63, %v2524_v50 }
 0x82c   :  { %2526 = vrot.lane.b32.xlu0 %v2525_v32, %s2870_s1  ;;  %v1000_v34 = vsel %vm196_vm1, %v955_v30, 0  ;;  %1184 = vmatprep.subr.bf16.mxu1 %v2871_v2 }
 0x82d   :  { %2365 = vmatpush3.bf16.msra.mxu0 %v1000_v34 }
 0x82e   :  { %2361 = vmatmul.mubr.msk.bf16.vlgmr.msra.gmra.mrb[28].mxu1 %vm192_vm2, %v3123_v6  ;;  %2370 = vmatprep.subr.bf16.mxu0 %v2865_v1 }
 0x82f   :  { %1185 = vmatpush1.bf16.msra.mxu1 %v2542_v33 }
 0x830   :  { %2367 = vmatmul.mubr.msk.bf16.vlgmr.msra.gmra.mrb[32].mxu0 %vm192_vm2, %v3125_v7  ;;  %1186 = vmatprep.subr.bf16.mxu1 %v2871_v2 }
 0x831   :  { %2372 = vmatprep.mubr.msk.bf16.mxu0 %vm2866_vm0, %v2865_v1 }
 0x833   :  { %1187 = vmatpush1.bf16.msra.mxu1 %v2543_v3 }
 0x834   :  { %1188 = vmatprep.subr.bf16.mxu1 %v2871_v2 }
 0x837   :  { %1189 = vmatpush1.bf16.msra.mxu1 %v2544_v35 }
 0x838   :  { %1190 = vmatprep.subr.bf16.mxu1 %v2871_v2 }
 0x83b   :  { %1191 = vmatpush1.bf16.msra.mxu1 %v2545_v36 }
 0x83c   :  { %1192 = vmatprep.subr.bf16.mxu1 %v2871_v2 }
 0x83f   :  { %1193 = vmatpush1.bf16.msra.mxu1 %v2546_v37 }
 0x840   :  { %1194 = vmatprep.subr.bf16.mxu1 %v2871_v2 }
 0x843   :  { %1195 = vmatpush1.bf16.msra.mxu1 %v2547_v39 }
 0x844   :  { %1196 = vmatprep.subr.bf16.mxu1 %v2871_v2 }
 0x847   :  { %1197 = vmatpush1.bf16.msra.mxu1 %v2548_v40 }
 0x848   :  { %1198 = vmatprep.subr.bf16.mxu1 %v2871_v2 }
 0x84b   :  { %1199 = vmatpush1.bf16.msra.mxu1 %v2549_v42 }
 0x84c   :  { %1200 = vmatprep.subr.bf16.mxu1 %v2871_v2 }
 0x84f   :  { %1201 = vmatpush1.bf16.msra.mxu1 %v2550_v43 }
 0x850   :  { %1202 = vmatprep.subr.bf16.mxu1 %v2871_v2 }
 0x853   :  { %1203 = vmatpush1.bf16.msra.mxu1 %v2551_v44 }
 0x854   :  { %2400 = vmatprep.subr.bf16.mxu1 %v2865_v1 }
 0x89e   :  { %v2527_v47 = vpop.permute.xlu0 %2526 }
 0x89f   :  { %v2529_v53 = vunpack.i.h.bf16 %v2527_v47  ;;  %v2528_v54 = vunpack.i.l.bf16 %v2527_v47 }
 0x8a1   :  { %v1077_v13 = vsel %vm1076_vm10, %v1074_v5, %v2528_v54  ;;  %v1078_v14 = vsel %vm1076_vm10, %v1075_v8, %v2529_v53  ;;  %v2553_v5 = vld [vmem:[#allocation14] sm:$0xff]  }
 0x8a2   :  { %v2171_v16 = vpack.c.bf16 %v1078_v14, %v1077_v13 }
 0x901   :  { %v993_v52 = vpop.f32.mrb[28].mxu1 }
 0x902   :  { %v1042_v55 = vmul.f32 2.0, %v993_v52  ;;  %v2362_v56 = vpop.f32.mrb[29].mxu1 }
 0x903   :  { %v996_v57 = vpop.f32.mrb[30].mxu1  ;;  %v1036_v58 = vpop.f32.mrb[32].mxu0 }
 0x904   :  { %v1043_v59 = vmul.f32 2.0, %v1036_v58  ;;  %v2363_v60 = vpop.f32.mrb[31].mxu1  ;;  %v2368_v61 = vpop.f32.mrb[33].mxu0  ;;  %v1044_v9 = vsub.f32 %v1042_v55, %v3234_v0 }
 0x905   :  { %v1039_v4 = vpop.f32.mrb[34].mxu0 }
 0x906   :  { %v1045_v11 = vsub.f32 %v1043_v59, %v3237_v10  ;;  %v2369_v12 = vpop.f32.mrb[35].mxu0 }
 0x908   :  { %v2172_v15 = vpack.c.bf16 %v1045_v11, %v1044_v9  ;;  %v2554_v11 = vld [vmem:[#allocation14 + $0x48] sm:$0xff]  }
 0x90a   :  { %2132 = vmatprep.mubr.msk.bf16.mxu1 %vm1070_vm8, %v2172_v15  ;;  %v2555_v15 = vld [vmem:[#allocation14 + $0x8] sm:$0xff]  }
 0x90b   :  { %1217 = vmatmul.mubr.bf16.vlgmr.msra.gmra.mrb[32].mxu1 %v2171_v16 }
 0x90c   :  { %2402 = vmatprep.mubr.msk.bf16.mxu1 %vm2866_vm0, %v2865_v1 }
 0x9de   :  { %v1218_v41 = vpop.f32.mrb[32].mxu1 }
 0x9df   :  { %v1219_v17 = vadd.f32 %v2119_v38, %v1218_v41  ;;  %v1220_v18 = vpop.f32.mrb[33].mxu1  ;;  %v2556_v41 = vld [vmem:[#allocation14 + $0x50] sm:$0xff]  }
 0x9e0   :  { %v1221_v19 = vpop.f32.mrb[34].mxu1  ;;  %v2557_v18 = vld [vmem:[#allocation14 + $0x10] sm:$0xff]  }
 0x9e1   :  { %v3279_v20 = vmax.f32 %v1219_v17, 0.0  ;;  %v1222_v0 = vadd.f32 %v2119_v38, %v1221_v19  ;;  %v1223_v10 = vpop.f32.mrb[35].mxu1  ;;  %v2558_v19 = vld [vmem:[#allocation14 + $0x58] sm:$0xff]  }
 0x9e2   :  { %v2561_v10 = vld [vmem:[#allocation14 + $0x20] sm:$0xff]  }
 0x9e3   :  { %v3281_v21 = vmax.f32 %v1222_v0, 0.0  ;;  %v1227_v22 = vpack.c.bf16 %v3279_v20, %v3279_v20  ;;  %v2560_v0 = vld [vmem:[#allocation14 + $0x60] sm:$0xff]  }
 0x9e5   :  { %v1230_v23 = vsel %vm196_vm1, %v1227_v22, 0  ;;  %v1228_v24 = vpack.c.bf16 %v3281_v21, %v3281_v21  ;;  %v2562_v22 = vld [vmem:[#allocation14 + $0x68] sm:$0xff]  }
 0x9e6   :  { %2371 = vmatpush3.bf16.msra.mxu0 %v1230_v23  ;;  %v2563_v23 = vld [vmem:[#allocation14 + $0x28] sm:$0xff]  }
 0x9e7   :  { %2376 = vmatprep.subr.bf16.mxu0 %v2865_v1  ;;  %v1273_v25 = vsel %vm196_vm1, %v1228_v24, 0  ;;  %v2564_v24 = vld [vmem:[#allocation14 + $0x70] sm:$0xff]  }
 0x9e9   :  { %2373 = vmatmul.mubr.msk.bf16.vlgmr.msra.gmra.mrb[36].mxu0 %vm192_vm2, %v3123_v6 }
 0x9ea   :  { %2377 = vmatpush3.bf16.msra.mxu0 %v1273_v25  ;;  %2378 = vmatprep.mubr.msk.bf16.mxu0 %vm2866_vm0, %v2865_v1  ;;  %v2565_v25 = vld [vmem:[#allocation14 + $0x30] sm:$0xff]  }
 0x9eb   :  { %2382 = vmatprep.subr.bf16.mxu0 %v2865_v1 }
 0x9f1   :  { %2379 = vmatmul.mubr.msk.bf16.vlgmr.msra.gmra.mrb[40].mxu0 %vm192_vm2, %v3125_v7 }
 0x9f2   :  { %2384 = vmatprep.mubr.msk.bf16.mxu0 %vm2866_vm0, %v2865_v1 }
 0xabc   :  { %v1266_v26 = vpop.f32.mrb[36].mxu0 }
 0xabd   :  { %v1315_v27 = vpack.c.bf16 %v1266_v26, %v1266_v26  ;;  %v2374_v28 = vpop.f32.mrb[37].mxu0 }
 0xabe   :  { %v1269_v29 = vpop.f32.mrb[38].mxu0  ;;  %v2569_v28 = vld [vmem:[#allocation14 + $0x88] sm:$0xff]  }
 0xabf   :  { %v2375_v30 = vpop.f32.mrb[39].mxu0  ;;  %v1318_v31 = vsel %vm196_vm1, %v1315_v27, 0  ;;  %v2568_v27 = vld [vmem:[#allocation14 + $0x80] sm:$0xff]   ;;  %v2570_v29 = vld [vmem:[#allocation14 + $0x90] sm:$0xff]  }
 0xac0   :  { %2383 = vmatpush3.bf16.msra.mxu0 %v1318_v31  ;;  %v2571_v30 = vld [vmem:[#allocation14 + $0x98] sm:$0xff]  }
 0xac1   :  { %2388 = vmatprep.subr.bf16.mxu0 %v2865_v1 }
 0xac3   :  { %2385 = vmatmul.mubr.msk.bf16.vlgmr.msra.gmra.mrb[44].mxu0 %vm192_vm2, %v3123_v6 }
 0xac4   :  { %v1309_v32 = vpop.f32.mrb[40].mxu0  ;;  %2390 = vmatprep.mubr.msk.bf16.mxu0 %vm2866_vm0, %v2865_v1 }
 0xac5   :  { %v1316_v33 = vpack.c.bf16 %v1309_v32, %v1309_v32  ;;  %v2380_v34 = vpop.f32.mrb[41].mxu0  ;;  %v2535_v2 = vpack.i.bf16 %v1309_v32, %v1266_v26 }
 0xac6   :  { %v1312_v3 = vpop.f32.mrb[42].mxu0 }
 0xac7   :  { %2536 = vrot.lane.b32.xlu0 %v2535_v2, %s2858_s9  ;;  %v2381_v35 = vpop.f32.mrb[43].mxu0  ;;  %v1361_v36 = vsel %vm196_vm1, %v1316_v33, 0 }
 0xac8   :  { %2389 = vmatpush3.bf16.msra.mxu0 %v1361_v36 }
 0xac9   :  { %2394 = vmatprep.subr.bf16.mxu0 %v2865_v1 }
 0xacb   :  { %2391 = vmatmul.mubr.msk.bf16.vlgmr.msra.gmra.mrb[48].mxu0 %vm192_vm2, %v3125_v7 }
 0xacc   :  { %2396 = vmatprep.mubr.msk.bf16.mxu0 %vm2866_vm0, %v2865_v1 }
 0xb39   :  { %v2537_v31 = vpop.permute.xlu0 %2536 }
 0xb3a   :  { %v2538_v33 = vunpack.i.l.bf16 %v2537_v31 }
 0xb3c   :  { %v1607_v36 = vsel %vm1073_vm9, %v3279_v20, %v2538_v33 }
 0xb96   :  { %v1354_v37 = vpop.f32.mrb[44].mxu0 }
 0xb97   :  { %v1403_v39 = vmul.f32 2.0, %v1354_v37  ;;  %v2386_v40 = vpop.f32.mrb[45].mxu0 }
 0xb98   :  { %v1357_v42 = vpop.f32.mrb[46].mxu0 }
 0xb99   :  { %v3313_v43 = vsub.f32 %v1403_v39, %v3279_v20  ;;  %v2387_v44 = vpop.f32.mrb[47].mxu0 }
 0xb9b   :  { %v1407_v45 = vpack.c.bf16 %v3313_v43, %v3313_v43 }
 0xb9d   :  { %v1410_v46 = vsel %vm196_vm1, %v1407_v45, 0 }
 0xb9e   :  { %v1397_v47 = vpop.f32.mrb[48].mxu0  ;;  %2395 = vmatpush3.bf16.msra.mxu0 %v1410_v46 }
 0xb9f   :  { %v1404_v48 = vmul.f32 2.0, %v1397_v47  ;;  %v2392_v49 = vpop.f32.mrb[49].mxu0  ;;  %2406 = vmatprep.subr.bf16.mxu0 %v2865_v1 }
 0xba0   :  { %v1400_v50 = vpop.f32.mrb[50].mxu0 }
 0xba1   :  { %v3320_v51 = vsub.f32 %v1404_v48, %v3281_v21  ;;  %v2393_v52 = vpop.f32.mrb[51].mxu0  ;;  %2397 = vmatmul.mubr.msk.bf16.vlgmr.msra.gmra.mrb[52].mxu0 %vm192_vm2, %v3123_v6 }
 0xba2   :  { %2408 = vmatprep.mubr.msk.bf16.mxu0 %vm2866_vm0, %v2865_v1 }
 0xba3   :  { %v1408_v53 = vpack.c.bf16 %v3320_v51, %v3320_v51 }
 0xba5   :  { %v1453_v54 = vsel %vm196_vm1, %v1408_v53, 0 }
 0xba6   :  { %2401 = vmatpush3.bf16.msra.mxu1 %v1453_v54 }
 0xba7   :  { %2412 = vmatprep.subr.bf16.mxu1 %v2865_v1 }
 0xba9   :  { %2403 = vmatmul.mubr.msk.bf16.vlgmr.msra.gmra.mrb[36].mxu1 %vm192_vm2, %v3125_v7 }
 0xbaa   :  { %2414 = vmatprep.mubr.msk.bf16.mxu1 %vm2866_vm0, %v2865_v1 }
 0xc74   :  { %v1446_v55 = vpop.f32.mrb[52].mxu0 }
 0xc75   :  { %v1495_v56 = vmul.f32 2.0, %v1446_v55  ;;  %v2398_v57 = vpop.f32.mrb[53].mxu0 }
 0xc76   :  { %v1449_v58 = vpop.f32.mrb[54].mxu0  ;;  %v1903_v57 = vld [vmem:[#allocation17 + $0x8] sm:$0xff] }
 0xc77   :  { %v1497_v59 = vsub.f32 %v1495_v56, %v1266_v26  ;;  %v2399_v60 = vpop.f32.mrb[55].mxu0  ;;  %v2566_v26 = vld [vmem:[#allocation14 + $0x78] sm:$0xff]   ;;  %v1902_v56 = vld [vmem:[#allocation17] sm:$0xff] }
 0xc78   :  { %v2457_v58 = vpack.c.bf16 %v1903_v57, %v1902_v56  ;;  %v1904_v60 = vld [vmem:[#allocation17 + $0x10] sm:$0xff] }
 0xc79   :  { %v1499_v61 = vpack.c.bf16 %v1497_v59, %v1497_v59 }
 0xc7b   :  { %v1502_v63 = vsel %vm196_vm1, %v1499_v61, 0  ;;  %v1905_v61 = vld [vmem:[#allocation17 + $0x18] sm:$0xff] }
 0xc7c   :  { %v1489_v4 = vpop.f32.mrb[36].mxu1  ;;  %2407 = vmatpush3.bf16.msra.mxu0 %v1502_v63 }
 0xc7d   :  { %v1496_v8 = vmul.f32 2.0, %v1489_v4  ;;  %v2404_v9 = vpop.f32.mrb[37].mxu1  ;;  %2227 = vmatprep.subr.bf16.mxu0 %v2552_v62  ;;  %v2460_v62 = vpack.c.bf16 %v1905_v61, %v1904_v60  ;;  %v1908_v4 = vld [vmem:[#allocation17 + $0x30] sm:$0xff] }
 0xc7e   :  { %v1492_v12 = vpop.f32.mrb[38].mxu1 }
 0xc7f   :  { %v1498_v13 = vsub.f32 %v1496_v8, %v1309_v32  ;;  %v2405_v14 = vpop.f32.mrb[39].mxu1  ;;  %2409 = vmatmul.mubr.msk.bf16.vlgmr.msra.gmra.mrb[56].mxu0 %vm192_vm2, %v3123_v6  ;;  %v2559_v6 = vld [vmem:[#allocation14 + $0x18] sm:$0xff]   ;;  %v2539_v32 = vunpack.i.h.bf16 %v2537_v31 }
 0xc80   :  { %2228 = vmatpush3.bf16.msra.mxu0 %v2553_v5  ;;  %v1909_v5 = vld [vmem:[#allocation17 + $0x38] sm:$0xff] }
 0xc81   :  { %v1500_v16 = vpack.c.bf16 %v1498_v13, %v1498_v13  ;;  %v2530_v38 = vpack.i.bf16 %v1498_v13, %v1497_v59  ;;  %2229 = vmatprep.subr.bf16.mxu0 %v2554_v11  ;;  %v1608_v35 = vsel %vm1073_vm9, %v3281_v21, %v2539_v32  ;;  %v2872_v59 = vmov 0.0|0.0  }
 0xc82   :  { %v2173_v42 = vpack.c.bf16 %v1608_v35, %v1607_v36  ;;  %v2466_v8 = vpack.c.bf16 %v1909_v5, %v1908_v4  ;;  %v1994_v36 = vld [vmem:[#allocation20] sm:$0xff] }
 0xc83   :  { %2531 = vrot.lane.b32.xlu1 %v2530_v38, %s2858_s9  ;;  %v1545_v17 = vsel %vm196_vm1, %v1500_v16, 0  ;;  %v2141_v16 = vld [vmem:[#allocation15] ss:$0 sm:$0xff]  ;;  %s2873_s9 = smov [#allocation21]  }
 0xc84   :  { %2413 = vmatpush3.bf16.msra.mxu1 %v1545_v17  ;;  %2230 = vmatpush3.bf16.msra.mxu0 %v2555_v15  ;;  %s2084_s4 = sshll.u32 %s2873_s9, 4  ;;  %s2085_s4 = int_to_ptr.vmem [resolvable:$true] %s2084_s4 }
 0xc85   :  { %2231 = vmatprep.subr.bf16.mxu0 %v2556_v41  ;;  %2418 = vmatprep.subr.bf16.mxu1 %v2865_v1  ;;  %s2814_s29 = scalar_lea.vmem %s2085_s4, 32  ;;  %p2819_p5 = scmp.lt.s32.totalorder %s2085_s4, %s2085_s4 }
 0xc86   :  { %p2815_p4 = scmp.ne.s32.totalorder %s2085_s4, %s2814_s29  ;;  %p2820_p6 = scmp.lt.s32.totalorder %s2814_s29, %s2814_s29 }
 0xc87   :  { %2415 = vmatmul.mubr.msk.bf16.vlgmr.msra.gmra.mrb[40].mxu1 %vm192_vm2, %v3125_v7  ;;  %v2567_v7 = vld [vmem:[#allocation14 + $0x38] sm:$0xff]  }
 0xc88   :  { %2232 = vmatpush3.bf16.msra.mxu0 %v2557_v18  ;;  %2426 = vmatprep.mubr.msk.bf16.mxu1 %vm2866_vm0, %v2865_v1  ;;  %p2821_p7 = por %p2820_p6, %p2819_p5 }
 0xc89   :  { %2233 = vmatprep.subr.bf16.mxu0 %v2558_v19  ;;  %2419 = vmatpush3.bf16.msra.mxu1 %v2568_v27 }
 0xc8a   :  { %2420 = vmatprep.subr.bf16.mxu1 %v2865_v1  ;;  %p2822_p8 = pnand %p2821_p7, %p2815_p4 }
 0xc8c   :  { %2234 = vmatpush3.bf16.msra.mxu0 %v2559_v6 }
 0xc8d   :  { %2235 = vmatprep.subr.bf16.mxu0 %v2560_v0  ;;  %2421 = vmatpush3.bf16.msra.mxu1 %v2569_v28 }
 0xc8e   :  { %2422 = vmatprep.subr.bf16.mxu1 %v2865_v1 }
 0xc90   :  { %2236 = vmatpush3.bf16.msra.mxu0 %v2561_v10 }
 0xc91   :  { %2237 = vmatprep.subr.bf16.mxu0 %v2562_v22  ;;  %2423 = vmatpush3.bf16.msra.mxu1 %v2570_v29 }
 0xc92   :  { %2424 = vmatprep.subr.bf16.mxu1 %v2865_v1 }
 0xc94   :  { %2238 = vmatpush3.bf16.msra.mxu0 %v2563_v23 }
 0xc95   :  { %2239 = vmatprep.subr.bf16.mxu0 %v2564_v24  ;;  %2425 = vmatpush3.bf16.msra.mxu1 %v2571_v30 }
 0xc96   :  { %2456 = vmatprep.subr.bf16.mxu1 %v2872_v59 }
 0xc98   :  { %2240 = vmatpush3.bf16.msra.mxu0 %v2565_v25 }
 0xc99   :  { %2241 = vmatprep.subr.bf16.mxu0 %v2566_v26 }
 0xc9c   :  { %2242 = vmatpush3.bf16.msra.mxu0 %v2567_v7 }
 0xcf5   :  { %v2532_v34 = vpop.permute.xlu1 %2531 }
 0xcf6   :  { %v2534_v2 = vunpack.i.h.bf16 %v2532_v34  ;;  %v2533_v3 = vunpack.i.l.bf16 %v2532_v34 }
 0xcf8   :  { %v1609_v37 = vsel %vm1073_vm9, %v3313_v43, %v2533_v3  ;;  %v1610_v39 = vsel %vm1073_vm9, %v3320_v51, %v2534_v2 }
 0xcf9   :  { %v2174_v40 = vpack.c.bf16 %v1610_v39, %v1609_v37  ;;  %v1995_v37 = vld [vmem:[#allocation20 + $0x8] sm:$0xff] }
 0xcfa   :  { %v2469_v39 = vpack.c.bf16 %v1995_v37, %v1994_v36 }
 0xcfb   :  { %1836 = vmatprep.mubr.bf16.mxu0 %v2174_v40  ;;  %v2166_v40 = vld [vmem:[#allocation18] ss:$0 sm:$0xff] }
 0xcfc   :  { %1837 = vmatmul.mubr.bf16.vlgmr.msra.gmra.mrb[60].mxu0 %v2173_v42 }
 0xd52   :  { %v1538_v44 = vpop.f32.mrb[56].mxu0 }
 0xd53   :  { %v2410_v45 = vpop.f32.mrb[57].mxu0  ;;  %v1587_v48 = vmul.f32 2.0, %v1538_v44 }
 0xd54   :  { %v1541_v46 = vpop.f32.mrb[58].mxu0 }
 0xd55   :  { %v2411_v47 = vpop.f32.mrb[59].mxu0  ;;  %v1589_v20 = vsub.f32 %v1587_v48, %v3313_v43  ;;  %v1906_v43 = vld [vmem:[#allocation17 + $0x20] sm:$0xff] }
 0xd56   :  { %v2168_v47 = vld [vmem:[#allocation2] ss:$0 sm:$0xff] }
 0xd5a   :  { %v1581_v49 = vpop.f32.mrb[40].mxu1 }
 0xd5b   :  { %v1588_v21 = vmul.f32 2.0, %v1581_v49  ;;  %v2416_v50 = vpop.f32.mrb[41].mxu1 }
 0xd5c   :  { %v1584_v52 = vpop.f32.mrb[42].mxu1 }
 0xd5d   :  { %v1590_v53 = vsub.f32 %v1588_v21, %v3320_v51  ;;  %v2417_v54 = vpop.f32.mrb[43].mxu1  ;;  %v1907_v51 = vld [vmem:[#allocation17 + $0x28] sm:$0xff] }
 0xd5e   :  { %v2463_v63 = vpack.c.bf16 %v1907_v51, %v1906_v43 }
 0xd5f   :  { %v2175_v55 = vpack.c.bf16 %v1590_v53, %v1589_v20 }
 0xd61   :  { %2427 = vmatmul.mubr.msk.bf16.vlgmr.msra.gmra.mrb[44].mxu1 %vm1073_vm9, %v2175_v55 }
 0xd62   :  { %2446 = vmatprep.mubr.msk.f32.mxu1 %vm2866_vm0, %v2865_v1  ;;  %2458 = vmatpush3.bf16.msra.mxu1 %v2457_v58 }
 0xd63   :  { %2459 = vmatprep.subr.bf16.mxu1 %v2872_v59 }
 0xd66   :  { %2461 = vmatpush3.bf16.msra.mxu1 %v2460_v62 }
 0xd67   :  { %2462 = vmatprep.subr.bf16.mxu1 %v2872_v59 }
 0xd6a   :  { %2464 = vmatpush3.bf16.msra.mxu1 %v2463_v63 }
 0xd6b   :  { %2465 = vmatprep.subr.bf16.mxu1 %v2872_v59 }
 0xd6e   :  { %2467 = vmatpush3.bf16.msra.mxu1 %v2466_v8 }
 0xd6f   :  { %2468 = vmatprep.subr.bf16.mxu1 %v2872_v59 }
 0xdcf   :  { %v2243_v9 = vpop.f32.mrb[60].mxu0 }
 0xdd0   :  { %v2244_v11 = vpop.f32.mrb[61].mxu0 }
 0xdd1   :  { %v2245_v12 = vadd.f32 %v2244_v11, %v2243_v9  ;;  %v2246_v13 = vpop.f32.mrb[62].mxu0 }
 0xdd2   :  { %v2247_v14 = vpop.f32.mrb[63].mxu0 }
 0xdd3   :  { %v2248_v15 = vadd.f32 %v2247_v14, %v2246_v13  ;;  %v1839_v38 = vadd.f32 %v2245_v12, %v2141_v16 }
 0xdd5   :  { %v1842_v19 = vadd.f32 %v2248_v15, %v2141_v16 }
 0xe34   :  { %v1879_v41 = vpop.f32.mrb[44].mxu1 }
 0xe35   :  { %v1880_v17 = vadd.f32 %v1879_v41, %v1839_v38  ;;  %v2428_v18 = vpop.f32.mrb[45].mxu1 }
 0xe36   :  { %v1882_v6 = vpop.f32.mrb[46].mxu1 }
 0xe37   :  { %v1886_v0 = vmax.f32 %v1880_v17, 0.0  ;;  %v1883_v10 = vadd.f32 %v1882_v6, %v1842_v19  ;;  %v2429_v22 = vpop.f32.mrb[47].mxu1 }
 0xe39   :  { %v1888_v23 = vsel %vm1073_vm9, %v1886_v0, -inf  ;;  %v1887_v24 = vmax.f32 %v1883_v10, 0.0 }
 0xe3a   :  { %v1889_v25 = vrot.slane %v1888_v23, 4 }
 0xe3b   :  { %v1895_v26 = vsel %vm1073_vm9, %v1887_v24, -inf }
 0xe3c   :  { %v1890_v7 = vmax.f32 %v1888_v23, %v1889_v25  ;;  %v1896_v27 = vrot.slane %v1895_v26, 4 }
 0xe3e   :  { %v1891_v28 = vrot.slane %v1890_v7, 2  ;;  %v1897_v29 = vmax.f32 %v1895_v26, %v1896_v27 }
 0xe40   :  { %v1892_v30 = vmax.f32 %v1890_v7, %v1891_v28  ;;  %v1898_v31 = vrot.slane %v1897_v29, 2 }
 0xe42   :  { %v1893_v32 = vrot.slane %v1892_v30, 1  ;;  %v1899_v33 = vmax.f32 %v1897_v29, %v1898_v31 }
 0xe44   :  { %v1900_v34 = vrot.slane %v1899_v33, 1  ;;  %v1894_v2 = vmax.f32 %v1892_v30, %v1893_v32 }
 0xe46   :  { %v1901_v3 = vmax.f32 %v1899_v33, %v1900_v34 }
 0xe48   :  { %v1920_v35 = vsel %vm1919_vm11, %v1901_v3, %v1894_v2 }
 0xe49   :  { %2447 = vmatmul.mubr.msk.f32.vlgmr.msra.gmra.mrb[48].mxu1 %vm1073_vm9, %v1920_v35 }
 0xe4a   :  { %2453 = vmatprep.mubr.msk.f32.mxu1 %vm2866_vm0, %v2865_v1  ;;  %2470 = vmatpush3.bf16.msra.mxu1 %v2469_v39 }
 0xf1c   :  { %v1989_v42 = vpop.f32.mrb[48].mxu1 }
 0xf1d   :  { %v1990_v44 = vadd.f32 %v2166_v40, %v1989_v42  ;;  %v2448_v45 = vpop.f32.mrb[49].mxu1 }
 0xf1f   :  { %v1993_v46 = vmax.f32 %v1990_v44, 0.0 }
 0xf21   :  { %2454 = vmatmul.mubr.msk.f32.vlgmr.msra.gmra.mrb[50].mxu1 %vm602_vm6, %v1993_v46 }
 0xff4   :  { %v2072_v48 = vpop.f32.mrb[50].mxu1 }
 0xff5   :  { %v2073_v49 = vadd.f32 %v2168_v47, %v2072_v48  ;;  %v2455_v21 = vpop.f32.mrb[51].mxu1 }
 0xff7   :  { %2077 = vst.msk [vmem:[#allocation21] sm:$0x3] %vm2076_vm12, %v2073_v49 }
 0xff8   :  { %2825 = shalt.err (!%p2822_p8)
}
 0xff9   :  { %s2826_s20 = scalar_lea.hbm %s3390_s12, 32 }
 0xffa   :  { %p2827_p9 = scmp.ne.s32.totalorder %s3390_s12, %s2826_s20  ;;  %p2830_p10 = scmp.lt.u32.totalorder %s2826_s20, %s3390_s12 }
 0xffc   :  { %p2832_p11 = pnand %p2830_p10, %p2827_p9 }
 0xffe   :  { %2835 = shalt.err (!%p2832_p11)
}
 0xfff   :  { %2087 = dma.vmem_to_hbm [thread:$0]  %s2085_s4, 32, %s3390_s12, [#allocation5]  }
0x1000   :  { %2848 = dma.done.wait [#allocation5], 32  }
0x1001   :  { %2849 = vsyncadd [#allocation5], 4294967264 }
0x1002   :  { %2091 = vsyncpa [#allocation4], 1 }
0x1003   :  { %2092 = vsyncpa [#allocation7], 1 }
0x1004   :  { %2093 = vsyncpa [#allocation10], 1 }
0x1005   :  { %2094 = vsyncpa [#allocation13], 1 }
0x1006   :  { %2095 = vsyncpa [#allocation16], 1 }
0x1007   :  { %2096 = vsyncpa [#allocation19], 1 }
0x1008   :  { %2097 = vsyncpa [#allocation5], 1 }

</bundles_post_ra>
